<compile_context>
chip_gen: v5e
topology: v5e:2x2
jax: 0.10.0
libtpu: 0.0.40
codegen_flags: <defaults>
</compile_context>

<pallas_src>
import functools

import jax
import jax.numpy as jnp
from jax.experimental import pallas as pl
from jax.experimental.pallas import tpu as pltpu

EPS = 1e-5
LANE = 128  # TPU lane width; channel dims are padded to this for lane-dense IO.


def _round_up(x, m):
    return (x + m - 1) // m * m


def _pick_row_tile(H, W, target_rows=1024):
    """Largest row tile TH dividing H with TH*W ~<= target_rows."""
    th = max(1, min(H, target_rows // max(W, 1)))
    while H % th:
        th -= 1
    return th


# ----------------------------------------------------------------------------
# Pallas kernel: fused 3x3 conv (as 9 shifted matmuls) + folded-BN shift
#                (+ residual) + ReLU, over one (batch, row-tile) block.
# ----------------------------------------------------------------------------
def _conv3x3_fused_kernel(x_ref, w_ref, b_ref, *rest,
                          TH, W, Cp, Cop, add_residual):
    # x_ref: (1, H+2, W+2, Cp)  bf16  spatially+channel padded image (resident
    #                                  across row tiles: its block index only
    #                                  depends on the batch grid axis)
    # w_ref: (3, 3, Cp, Cop)    bf16  HWIO weights with BN scale folded in
    # b_ref: (1, Cop)           f32   folded BN shift
    # rest : (r_ref?, o_ref)          residual tile (1,TH,W,Cop) f32 and output
    if add_residual:
        r_ref, o_ref = rest
    else:
        (o_ref,) = rest

    row0 = pl.multiple_of(pl.program_id(1) * TH, TH)

    # Seed the accumulator with the folded-BN shift (saves an epilogue add).
    acc = jnp.broadcast_to(b_ref[...], (TH * W, Cop)).astype(jnp.float32)
    # 9 shifted taps: output row r, col c uses padded input row r+kh, col c+kw.
    for kh in range(3):
        for kw in range(3):
            patch = x_ref[0, pl.ds(row0 + kh, TH), pl.ds(kw, W), :]   # (TH,W,Cp)
            patch = patch.reshape(TH * W, Cp)
            acc = acc + jnp.dot(patch, w_ref[kh, kw, :, :],
                                preferred_element_type=jnp.float32)

    y = acc
    if add_residual:
        y = y + r_ref[...].reshape(TH * W, Cop)
    y = jnp.maximum(y, 0.0)
    o_ref[...] = y.reshape(1, TH, W, Cop).astype(o_ref.dtype)


def conv3x3_bn_act(x_sp, w, shift, residual=None, *, row_tile=None,
                   out_dtype=jnp.float32):
    """Fused conv3x3(pad=1,stride=1) + BN (folded) [+ residual] + ReLU.

    x_sp:     [N, H+2, W+2, Cp]  bf16 (spatially + channel padded, NHWC)
    w:        [3, 3, Cp, Cop]    bf16 (BN scale already folded into columns)
    shift:    [1, Cop]           f32
    residual: [N, H, W, Cop]     f32 or None
    returns:  [N, H, W, Cop]     out_dtype
    """
    N, Hp2, Wp2, Cp = x_sp.shape
    H, W = Hp2 - 2, Wp2 - 2
    Cop = w.shape[-1]
    assert Cp % LANE == 0 and Cop % LANE == 0, "channel dims must be lane-padded"
    assert W % 8 == 0, "width must be a multiple of 8 for tile-aligned reshapes"

    TH = row_tile or _pick_row_tile(H, W)
    assert H % TH == 0, "row tile must divide H"
    grid = (N, H // TH)

    kernel = functools.partial(
        _conv3x3_fused_kernel, TH=TH, W=W, Cp=Cp, Cop=Cop,
        add_residual=residual is not None)

    in_specs = [
        # Whole padded image per batch element; index depends only on n, so it
        # stays resident (no re-DMA) across the row-tile axis.
        pl.BlockSpec((1, Hp2, Wp2, Cp), lambda n, i: (n, 0, 0, 0)),
        # Weights / shift resident across the whole grid.
        pl.BlockSpec((3, 3, Cp, Cop), lambda n, i: (0, 0, 0, 0)),
        pl.BlockSpec((1, Cop), lambda n, i: (0, 0)),
    ]
    args = [x_sp, w, shift]
    if residual is not None:
        in_specs.append(pl.BlockSpec((1, TH, W, Cop), lambda n, i: (n, i, 0, 0)))
        args.append(residual)

    return pl.pallas_call(
        kernel,
        out_shape=jax.ShapeDtypeStruct((N, H, W, Cop), out_dtype),
        grid=grid,
        in_specs=in_specs,
        out_specs=pl.BlockSpec((1, TH, W, Cop), lambda n, i: (n, i, 0, 0)),
        compiler_params=pltpu.CompilerParams(
            dimension_semantics=("parallel", "parallel")),
    )(*args)


# ----------------------------------------------------------------------------
# HookedModel (JAX): wraps a BasicBlock; hooks mutate named intermediate acts.
# ----------------------------------------------------------------------------
class HookedModel:
    """Mirrors the PyTorch HookedModel interface (forward/apply_hook/remove_hooks).

    Hooks are plain activation->activation functions keyed by layer name:
      "relu1": receives the first ReLU output in NHWC layout, channel-padded
               to 128 lanes ([N, H, W, Cp], bf16); padded channels are zero.
      "out":   receives the final block output in NCHW ([N, C, H, W], f32).
    """

    def __init__(self, params, row_tile=None):
        self.params = params
        self.row_tile = row_tile
        self.hooks = []
        self._prepared = self._prepare(params)

    # --- hook interface (mirrors PyTorch HookedModel) ------------------------
    def apply_hook(self, layer_name, hook):
        # TODO(synk): PyTorch register_forward_hook receives (module, input,
        # output) on the named nn.Module in NCHW; here hooks are plain
        # activation->activation functions and "relu1" is presented in the
        # kernel's native NHWC channel-padded layout to avoid layout churn.
        self.hooks.append((layer_name, hook))

    def remove_hooks(self):
        self.hooks = []

    def _run_hooks(self, name, act):
        for lname, fn in self.hooks:
            if lname == name:
                act = fn(act)
        return act

    # --- parameter preparation: fold BN, pad channels, cast bf16 -------------
    def _prepare(self, p):
        C = p["w1"].shape[0]
        Cp = _round_up(C, LANE)

        def prep(w_oihw, g, b, m, v):
            scale = g / jnp.sqrt(v + EPS)
            shift = b - m * scale
            # OIHW -> HWIO, fold BN scale into output-channel columns.
            w_hwio = jnp.transpose(w_oihw, (2, 3, 1, 0)) * scale[None, None, None, :]
            w_pad = jnp.pad(w_hwio, ((0, 0), (0, 0), (0, Cp - C), (0, Cp - C)))
            shift_pad = jnp.pad(shift, (0, Cp - C)).reshape(1, Cp)
            return w_pad.astype(jnp.bfloat16), shift_pad.astype(jnp.float32)

        w1, b1 = prep(p["w1"], p["bn1_g"], p["bn1_b"], p["bn1_m"], p["bn1_v"])
        w2, b2 = prep(p["w2"], p["bn2_g"], p["bn2_b"], p["bn2_m"], p["bn2_v"])
        return {"w1": w1, "b1": b1, "w2": w2, "b2": b2, "C": C, "Cp": Cp}

    # --- forward --------------------------------------------------------------
    def forward(self, x):
        # x: [N, C, H, W] float32 (PyTorch layout at the module boundary)
        pp = self._prepared
        C, Cp = pp["C"], pp["Cp"]

        # NCHW -> NHWC once at the boundary; pad channels to lane width.
        x_nhwc = jnp.transpose(x, (0, 2, 3, 1))
        x_nhwc = jnp.pad(x_nhwc, ((0, 0), (0, 0), (0, 0), (0, Cp - C)))
        x_sp = jnp.pad(x_nhwc, ((0, 0), (1, 1), (1, 1), (0, 0))).astype(jnp.bfloat16)

        # conv1 -> bn1 -> relu (fused; no residual operand, no zero-residual DMA).
        # Intermediate stays bf16: it is consumed as a bf16 MXU operand anyway,
        # so this halves the inter-kernel HBM write + re-read with no extra
        # precision loss vs. casting before conv2.
        y1 = conv3x3_bn_act(x_sp, pp["w1"], pp["b1"], residual=None,
                            row_tile=self.row_tile, out_dtype=jnp.bfloat16)
        y1 = self._run_hooks("relu1", y1)            # NHWC [N,H,W,Cp]

        # conv2 -> bn2 -> +identity -> relu (fused; real f32 residual tile read)
        y1_sp = jnp.pad(y1, ((0, 0), (1, 1), (1, 1), (0, 0))).astype(jnp.bfloat16)
        y2 = conv3x3_bn_act(y1_sp, pp["w2"], pp["b2"], residual=x_nhwc,
                            row_tile=self.row_tile, out_dtype=jnp.float32)

        # Back to NCHW only at the module boundary.
        out = jnp.transpose(y2[..., :C], (0, 3, 1, 2))
        return self._run_hooks("out", out)

    __call__ = forward


# ----------------------------------------------------------------------------
# Pure-JAX reference (for correctness check of the Pallas path)
# ----------------------------------------------------------------------------
def ref_forward(params, x, hooks=()):
    def conv(h, w):
        return jax.lax.conv_general_dilated(
            h, w, (1, 1), ((1, 1), (1, 1)),
            dimension_numbers=("NCHW", "OIHW", "NCHW"),
            precision=jax.lax.Precision.HIGHEST,
        )

    def bn(h, g, b, m, v):
        g, b, m, v = (a[None, :, None, None] for a in (g, b, m, v))
        return g * (h - m) / jnp.sqrt(v + EPS) + b

    p = params
    h = jax.nn.relu(bn(conv(x, p["w1"]), p["bn1_g"], p["bn1_b"], p["bn1_m"], p["bn1_v"]))
    for name, fn in hooks:
        if name == "relu1":
            h = fn(h)
    out = jax.nn.relu(bn(conv(h, p["w2"]), p["bn2_g"], p["bn2_b"], p["bn2_m"], p["bn2_v"]) + x)
    for name, fn in hooks:
        if name == "out":
            out = fn(out)
    return out


# ----------------------------------------------------------------------------
def make_params(C):
    key = jax.random.PRNGKey(0)
    k1, k2 = jax.random.split(key)
    fan_in = C * 9
    return {
        "w1": (jax.random.normal(k1, (C, C, 3, 3), jnp.float32) / jnp.sqrt(fan_in)),
        "w2": (jax.random.normal(k2, (C, C, 3, 3), jnp.float32) / jnp.sqrt(fan_in)),
        "bn1_g": 1.0 + 0.05 * jnp.arange(C, dtype=jnp.float32),
        "bn1_b": 0.01 * jnp.arange(C, dtype=jnp.float32),
        "bn1_m": 0.02 * jnp.arange(C, dtype=jnp.float32),
        "bn1_v": 1.0 + 0.1 * jnp.arange(C, dtype=jnp.float32),
        "bn2_g": 1.0 - 0.03 * jnp.arange(C, dtype=jnp.float32),
        "bn2_b": -0.02 * jnp.arange(C, dtype=jnp.float32),
        "bn2_m": 0.01 * jnp.arange(C, dtype=jnp.float32),
        "bn2_v": 1.0 + 0.05 * jnp.arange(C, dtype=jnp.float32),
    }


def _assert_close(a, b, msg, tol=5e-2):
    err = float(jnp.max(jnp.abs(a - b)))
    assert err < tol, f"{msg}: max abs err {err:.4f} >= {tol}"


if __name__ == "__main__":
    N, C, H, W = 2, 4, 16, 16
    x = jax.random.normal(jax.random.PRNGKey(0), (N, C, H, W), jnp.float32)

    params = make_params(C)
    # row_tile=8 -> grid (N, 2): exercises the row-tiled, pipelined path.
    model = HookedModel(params, row_tile=8)

    # 1) plain forward (no hooks) == wrapped BasicBlock forward
    out = jax.block_until_ready(model(x))
    ref = ref_forward(params, x)
    # bf16 MXU operands vs. f32 HIGHEST-precision reference -> loosened tolerance.
    _assert_close(out, ref, "plain forward mismatch")

    # 2) apply an ablation hook (zero channel 1 of relu1), evaluate, remove hooks.
    Cp = model._prepared["Cp"]
    mask_nhwc = jnp.ones((1, 1, 1, Cp), jnp.float32).at[0, 0, 0, 1].set(0.0)
    ablate_pallas = lambda act: act * mask_nhwc            # NHWC channel-padded
    mask_nchw = jnp.ones((1, C, 1, 1), jnp.float32).at[0, 1, 0, 0].set(0.0)
    ablate_ref = lambda act: act * mask_nchw                # NCHW reference hook
    model.apply_hook("relu1", ablate_pallas)
    out_ablated = jax.block_until_ready(model(x))
    ref_ablated = ref_forward(params, x, hooks=[("relu1", ablate_ref)])
    _assert_close(out_ablated, ref_ablated, "hooked forward mismatch")
    model.remove_hooks()

    # 3) after remove_hooks the forward matches the unhooked model again
    out2 = jax.block_until_ready(model(x))
    _assert_close(out2, ref, "remove_hooks mismatch")

    print("KERNEL_OK")
</pallas_src>

<mosaic_0001>
module attributes {stable_mosaic.version = 11 : i64} {
  func.func @_conv3x3_fused_kernel(%arg0: i32, %arg1: i32, %arg2: memref<1x18x18x128xbf16, #tpu.memory_space<vmem>>, %arg3: memref<3x3x128x128xbf16, #tpu.memory_space<vmem>>, %arg4: memref<1x128xf32, #tpu.memory_space<vmem>>, %arg5: memref<1x8x16x128xbf16, #tpu.memory_space<vmem>>) attributes {dimension_semantics = [#tpu.dimension_semantics<parallel>, #tpu.dimension_semantics<parallel>], iteration_bounds = array<i64: 2, 2>, scalar_prefetch = 0 : i64, scratch_operands = 0 : i64, tpu.core_type = #tpu.core_type<tc>, window_params = [{transform_indices = @transform_0, window_bounds = array<i64: 1, 18, 18, 128>}, {pipeline_mode = #tpu.pipeline_mode<synchronous>, transform_indices = @transform_1, window_bounds = array<i64: 3, 3, 128, 128>}, {pipeline_mode = #tpu.pipeline_mode<synchronous>, transform_indices = @transform_2, window_bounds = array<i64: 1, 128>}, {transform_indices = @transform_3, window_bounds = array<i64: 1, 8, 16, 128>}]} {
    %c8_i32 = arith.constant 8 : i32
    %0 = arith.muli %arg1, %c8_i32 : i32
    %1 = tpu.assume_multiple %0, 8 : i32
    %c0 = arith.constant 0 : index
    %c0_0 = arith.constant 0 : index
    %2 = vector.load %arg4[%c0, %c0_0] : memref<1x128xf32, #tpu.memory_space<vmem>>, vector<1x128xf32>
    %3 = vector.shape_cast %2 : vector<1x128xf32> to vector<1x128xf32>
    %4 = vector.broadcast %3 : vector<1x128xf32> to vector<128x128xf32>
    %c0_i32 = arith.constant 0 : i32
    %5 = arith.addi %1, %c0_i32 : i32
    %c0_1 = arith.constant 0 : index
    %6 = arith.index_cast %5 : i32 to index
    %c0_2 = arith.constant 0 : index
    %c0_3 = arith.constant 0 : index
    %7 = vector.load %arg2[%c0_1, %6, %c0_2, %c0_3] : memref<1x18x18x128xbf16, #tpu.memory_space<vmem>>, vector<1x8x16x128xbf16>
    %8 = vector.shape_cast %7 : vector<1x8x16x128xbf16> to vector<8x16x128xbf16>
    %9 = vector.shape_cast %8 : vector<8x16x128xbf16> to vector<128x128xbf16>
    %c0_4 = arith.constant 0 : index
    %c0_5 = arith.constant 0 : index
    %c0_6 = arith.constant 0 : index
    %c0_7 = arith.constant 0 : index
    %10 = vector.load %arg3[%c0_4, %c0_5, %c0_6, %c0_7] : memref<3x3x128x128xbf16, #tpu.memory_space<vmem>>, vector<1x1x128x128xbf16>
    %11 = vector.shape_cast %10 : vector<1x1x128x128xbf16> to vector<128x128xbf16>
    %cst = arith.constant dense<0.000000e+00> : vector<128x128xf32>
    %12 = tpu.matmul %9, %11, %cst {dimension_numbers = #tpu.dot_dimension_numbers<[1], [0], [0], [1], [0, 0, 1, 1], [], []>} : vector<128x128xbf16>, vector<128x128xbf16>, vector<128x128xf32> -> vector<128x128xf32>
    %13 = arith.addf %4, %12 : vector<128x128xf32>
    %c0_i32_8 = arith.constant 0 : i32
    %14 = arith.addi %1, %c0_i32_8 : i32
    %c0_9 = arith.constant 0 : index
    %15 = arith.index_cast %14 : i32 to index
    %c1 = arith.constant 1 : index
    %c0_10 = arith.constant 0 : index
    %16 = vector.load %arg2[%c0_9, %15, %c1, %c0_10] : memref<1x18x18x128xbf16, #tpu.memory_space<vmem>>, vector<1x8x16x128xbf16>
    %17 = vector.shape_cast %16 : vector<1x8x16x128xbf16> to vector<8x16x128xbf16>
    %18 = vector.shape_cast %17 : vector<8x16x128xbf16> to vector<128x128xbf16>
    %c0_11 = arith.constant 0 : index
    %c1_12 = arith.constant 1 : index
    %c0_13 = arith.constant 0 : index
    %c0_14 = arith.constant 0 : index
    %19 = vector.load %arg3[%c0_11, %c1_12, %c0_13, %c0_14] : memref<3x3x128x128xbf16, #tpu.memory_space<vmem>>, vector<1x1x128x128xbf16>
    %20 = vector.shape_cast %19 : vector<1x1x128x128xbf16> to vector<128x128xbf16>
    %cst_15 = arith.constant dense<0.000000e+00> : vector<128x128xf32>
    %21 = tpu.matmul %18, %20, %cst_15 {dimension_numbers = #tpu.dot_dimension_numbers<[1], [0], [0], [1], [0, 0, 1, 1], [], []>} : vector<128x128xbf16>, vector<128x128xbf16>, vector<128x128xf32> -> vector<128x128xf32>
    %22 = arith.addf %13, %21 : vector<128x128xf32>
    %c0_i32_16 = arith.constant 0 : i32
    %23 = arith.addi %1, %c0_i32_16 : i32
    %c0_17 = arith.constant 0 : index
    %24 = arith.index_cast %23 : i32 to index
    %c2 = arith.constant 2 : index
    %c0_18 = arith.constant 0 : index
    %25 = vector.load %arg2[%c0_17, %24, %c2, %c0_18] : memref<1x18x18x128xbf16, #tpu.memory_space<vmem>>, vector<1x8x16x128xbf16>
    %26 = vector.shape_cast %25 : vector<1x8x16x128xbf16> to vector<8x16x128xbf16>
    %27 = vector.shape_cast %26 : vector<8x16x128xbf16> to vector<128x128xbf16>
    %c0_19 = arith.constant 0 : index
    %c2_20 = arith.constant 2 : index
    %c0_21 = arith.constant 0 : index
    %c0_22 = arith.constant 0 : index
    %28 = vector.load %arg3[%c0_19, %c2_20, %c0_21, %c0_22] : memref<3x3x128x128xbf16, #tpu.memory_space<vmem>>, vector<1x1x128x128xbf16>
    %29 = vector.shape_cast %28 : vector<1x1x128x128xbf16> to vector<128x128xbf16>
    %cst_23 = arith.constant dense<0.000000e+00> : vector<128x128xf32>
    %30 = tpu.matmul %27, %29, %cst_23 {dimension_numbers = #tpu.dot_dimension_numbers<[1], [0], [0], [1], [0, 0, 1, 1], [], []>} : vector<128x128xbf16>, vector<128x128xbf16>, vector<128x128xf32> -> vector<128x128xf32>
    %31 = arith.addf %22, %30 : vector<128x128xf32>
    %c1_i32 = arith.constant 1 : i32
    %32 = arith.addi %1, %c1_i32 : i32
    %c0_24 = arith.constant 0 : index
    %33 = arith.index_cast %32 : i32 to index
    %c0_25 = arith.constant 0 : index
    %c0_26 = arith.constant 0 : index
    %34 = vector.load %arg2[%c0_24, %33, %c0_25, %c0_26] : memref<1x18x18x128xbf16, #tpu.memory_space<vmem>>, vector<1x8x16x128xbf16>
    %35 = vector.shape_cast %34 : vector<1x8x16x128xbf16> to vector<8x16x128xbf16>
    %36 = vector.shape_cast %35 : vector<8x16x128xbf16> to vector<128x128xbf16>
    %c1_27 = arith.constant 1 : index
    %c0_28 = arith.constant 0 : index
    %c0_29 = arith.constant 0 : index
    %c0_30 = arith.constant 0 : index
    %37 = vector.load %arg3[%c1_27, %c0_28, %c0_29, %c0_30] : memref<3x3x128x128xbf16, #tpu.memory_space<vmem>>, vector<1x1x128x128xbf16>
    %38 = vector.shape_cast %37 : vector<1x1x128x128xbf16> to vector<128x128xbf16>
    %cst_31 = arith.constant dense<0.000000e+00> : vector<128x128xf32>
    %39 = tpu.matmul %36, %38, %cst_31 {dimension_numbers = #tpu.dot_dimension_numbers<[1], [0], [0], [1], [0, 0, 1, 1], [], []>} : vector<128x128xbf16>, vector<128x128xbf16>, vector<128x128xf32> -> vector<128x128xf32>
    %40 = arith.addf %31, %39 : vector<128x128xf32>
    %c1_i32_32 = arith.constant 1 : i32
    %41 = arith.addi %1, %c1_i32_32 : i32
    %c0_33 = arith.constant 0 : index
    %42 = arith.index_cast %41 : i32 to index
    %c1_34 = arith.constant 1 : index
    %c0_35 = arith.constant 0 : index
    %43 = vector.load %arg2[%c0_33, %42, %c1_34, %c0_35] : memref<1x18x18x128xbf16, #tpu.memory_space<vmem>>, vector<1x8x16x128xbf16>
    %44 = vector.shape_cast %43 : vector<1x8x16x128xbf16> to vector<8x16x128xbf16>
    %45 = vector.shape_cast %44 : vector<8x16x128xbf16> to vector<128x128xbf16>
    %c1_36 = arith.constant 1 : index
    %c1_37 = arith.constant 1 : index
    %c0_38 = arith.constant 0 : index
    %c0_39 = arith.constant 0 : index
    %46 = vector.load %arg3[%c1_36, %c1_37, %c0_38, %c0_39] : memref<3x3x128x128xbf16, #tpu.memory_space<vmem>>, vector<1x1x128x128xbf16>
    %47 = vector.shape_cast %46 : vector<1x1x128x128xbf16> to vector<128x128xbf16>
    %cst_40 = arith.constant dense<0.000000e+00> : vector<128x128xf32>
    %48 = tpu.matmul %45, %47, %cst_40 {dimension_numbers = #tpu.dot_dimension_numbers<[1], [0], [0], [1], [0, 0, 1, 1], [], []>} : vector<128x128xbf16>, vector<128x128xbf16>, vector<128x128xf32> -> vector<128x128xf32>
    %49 = arith.addf %40, %48 : vector<128x128xf32>
    %c1_i32_41 = arith.constant 1 : i32
    %50 = arith.addi %1, %c1_i32_41 : i32
    %c0_42 = arith.constant 0 : index
    %51 = arith.index_cast %50 : i32 to index
    %c2_43 = arith.constant 2 : index
    %c0_44 = arith.constant 0 : index
    %52 = vector.load %arg2[%c0_42, %51, %c2_43, %c0_44] : memref<1x18x18x128xbf16, #tpu.memory_space<vmem>>, vector<1x8x16x128xbf16>
    %53 = vector.shape_cast %52 : vector<1x8x16x128xbf16> to vector<8x16x128xbf16>
    %54 = vector.shape_cast %53 : vector<8x16x128xbf16> to vector<128x128xbf16>
    %c1_45 = arith.constant 1 : index
    %c2_46 = arith.constant 2 : index
    %c0_47 = arith.constant 0 : index
    %c0_48 = arith.constant 0 : index
    %55 = vector.load %arg3[%c1_45, %c2_46, %c0_47, %c0_48] : memref<3x3x128x128xbf16, #tpu.memory_space<vmem>>, vector<1x1x128x128xbf16>
    %56 = vector.shape_cast %55 : vector<1x1x128x128xbf16> to vector<128x128xbf16>
    %cst_49 = arith.constant dense<0.000000e+00> : vector<128x128xf32>
    %57 = tpu.matmul %54, %56, %cst_49 {dimension_numbers = #tpu.dot_dimension_numbers<[1], [0], [0], [1], [0, 0, 1, 1], [], []>} : vector<128x128xbf16>, vector<128x128xbf16>, vector<128x128xf32> -> vector<128x128xf32>
    %58 = arith.addf %49, %57 : vector<128x128xf32>
    %c2_i32 = arith.constant 2 : i32
    %59 = arith.addi %1, %c2_i32 : i32
    %c0_50 = arith.constant 0 : index
    %60 = arith.index_cast %59 : i32 to index
    %c0_51 = arith.constant 0 : index
    %c0_52 = arith.constant 0 : index
    %61 = vector.load %arg2[%c0_50, %60, %c0_51, %c0_52] : memref<1x18x18x128xbf16, #tpu.memory_space<vmem>>, vector<1x8x16x128xbf16>
    %62 = vector.shape_cast %61 : vector<1x8x16x128xbf16> to vector<8x16x128xbf16>
    %63 = vector.shape_cast %62 : vector<8x16x128xbf16> to vector<128x128xbf16>
    %c2_53 = arith.constant 2 : index
    %c0_54 = arith.constant 0 : index
    %c0_55 = arith.constant 0 : index
    %c0_56 = arith.constant 0 : index
    %64 = vector.load %arg3[%c2_53, %c0_54, %c0_55, %c0_56] : memref<3x3x128x128xbf16, #tpu.memory_space<vmem>>, vector<1x1x128x128xbf16>
    %65 = vector.shape_cast %64 : vector<1x1x128x128xbf16> to vector<128x128xbf16>
    %cst_57 = arith.constant dense<0.000000e+00> : vector<128x128xf32>
    %66 = tpu.matmul %63, %65, %cst_57 {dimension_numbers = #tpu.dot_dimension_numbers<[1], [0], [0], [1], [0, 0, 1, 1], [], []>} : vector<128x128xbf16>, vector<128x128xbf16>, vector<128x128xf32> -> vector<128x128xf32>
    %67 = arith.addf %58, %66 : vector<128x128xf32>
    %c2_i32_58 = arith.constant 2 : i32
    %68 = arith.addi %1, %c2_i32_58 : i32
    %c0_59 = arith.constant 0 : index
    %69 = arith.index_cast %68 : i32 to index
    %c1_60 = arith.constant 1 : index
    %c0_61 = arith.constant 0 : index
    %70 = vector.load %arg2[%c0_59, %69, %c1_60, %c0_61] : memref<1x18x18x128xbf16, #tpu.memory_space<vmem>>, vector<1x8x16x128xbf16>
    %71 = vector.shape_cast %70 : vector<1x8x16x128xbf16> to vector<8x16x128xbf16>
    %72 = vector.shape_cast %71 : vector<8x16x128xbf16> to vector<128x128xbf16>
    %c2_62 = arith.constant 2 : index
    %c1_63 = arith.constant 1 : index
    %c0_64 = arith.constant 0 : index
    %c0_65 = arith.constant 0 : index
    %73 = vector.load %arg3[%c2_62, %c1_63, %c0_64, %c0_65] : memref<3x3x128x128xbf16, #tpu.memory_space<vmem>>, vector<1x1x128x128xbf16>
    %74 = vector.shape_cast %73 : vector<1x1x128x128xbf16> to vector<128x128xbf16>
    %cst_66 = arith.constant dense<0.000000e+00> : vector<128x128xf32>
    %75 = tpu.matmul %72, %74, %cst_66 {dimension_numbers = #tpu.dot_dimension_numbers<[1], [0], [0], [1], [0, 0, 1, 1], [], []>} : vector<128x128xbf16>, vector<128x128xbf16>, vector<128x128xf32> -> vector<128x128xf32>
    %76 = arith.addf %67, %75 : vector<128x128xf32>
    %c2_i32_67 = arith.constant 2 : i32
    %77 = arith.addi %1, %c2_i32_67 : i32
    %c0_68 = arith.constant 0 : index
    %78 = arith.index_cast %77 : i32 to index
    %c2_69 = arith.constant 2 : index
    %c0_70 = arith.constant 0 : index
    %79 = vector.load %arg2[%c0_68, %78, %c2_69, %c0_70] : memref<1x18x18x128xbf16, #tpu.memory_space<vmem>>, vector<1x8x16x128xbf16>
    %80 = vector.shape_cast %79 : vector<1x8x16x128xbf16> to vector<8x16x128xbf16>
    %81 = vector.shape_cast %80 : vector<8x16x128xbf16> to vector<128x128xbf16>
    %c2_71 = arith.constant 2 : index
    %c2_72 = arith.constant 2 : index
    %c0_73 = arith.constant 0 : index
    %c0_74 = arith.constant 0 : index
    %82 = vector.load %arg3[%c2_71, %c2_72, %c0_73, %c0_74] : memref<3x3x128x128xbf16, #tpu.memory_space<vmem>>, vector<1x1x128x128xbf16>
    %83 = vector.shape_cast %82 : vector<1x1x128x128xbf16> to vector<128x128xbf16>
    %cst_75 = arith.constant dense<0.000000e+00> : vector<128x128xf32>
    %84 = tpu.matmul %81, %83, %cst_75 {dimension_numbers = #tpu.dot_dimension_numbers<[1], [0], [0], [1], [0, 0, 1, 1], [], []>} : vector<128x128xbf16>, vector<128x128xbf16>, vector<128x128xf32> -> vector<128x128xf32>
    %85 = arith.addf %76, %84 : vector<128x128xf32>
    %cst_76 = arith.constant 0.000000e+00 : f32
    %86 = vector.broadcast %cst_76 : f32 to vector<128x128xf32>
    %87 = arith.maximumf %85, %86 : vector<128x128xf32>
    %88 = vector.shape_cast %87 : vector<128x128xf32> to vector<1x8x16x128xf32>
    %89 = arith.truncf %88 : vector<1x8x16x128xf32> to vector<1x8x16x128xbf16>
    %c0_77 = arith.constant 0 : index
    %c0_78 = arith.constant 0 : index
    %c0_79 = arith.constant 0 : index
    %c0_80 = arith.constant 0 : index
    %90 = vector.load %arg5[%c0_77, %c0_78, %c0_79, %c0_80] : memref<1x8x16x128xbf16, #tpu.memory_space<vmem>>, vector<1x8x16x128xbf16>
    tpu.vector_store %arg5[%c0_77, %c0_78, %c0_79, %c0_80], %89 {strides = array<i32>} : memref<1x8x16x128xbf16, #tpu.memory_space<vmem>>, vector<1x8x16x128xbf16>,
    return
  }
  func.func @transform_0(%arg0: i32, %arg1: i32) -> (i32, i32, i32, i32) {
    %c0_i32 = arith.constant 0 : i32
    %c0_i32_0 = arith.constant 0 : i32
    %c0_i32_1 = arith.constant 0 : i32
    %c0_i32_2 = arith.constant 0 : i32
    return %arg0, %c0_i32, %c0_i32_0, %c0_i32_1 : i32, i32, i32, i32
  }
  func.func @transform_1(%arg0: i32, %arg1: i32) -> (i32, i32, i32, i32) {
    %c0_i32 = arith.constant 0 : i32
    %c0_i32_0 = arith.constant 0 : i32
    %c0_i32_1 = arith.constant 0 : i32
    %c0_i32_2 = arith.constant 0 : i32
    %c0_i32_3 = arith.constant 0 : i32
    return %c0_i32, %c0_i32_0, %c0_i32_1, %c0_i32_2 : i32, i32, i32, i32
  }
  func.func @transform_2(%arg0: i32, %arg1: i32) -> (i32, i32) {
    %c0_i32 = arith.constant 0 : i32
    %c0_i32_0 = arith.constant 0 : i32
    %c0_i32_1 = arith.constant 0 : i32
    return %c0_i32, %c0_i32_0 : i32, i32
  }
  func.func @transform_3(%arg0: i32, %arg1: i32) -> (i32, i32, i32, i32) {
    %c0_i32 = arith.constant 0 : i32
    %c0_i32_0 = arith.constant 0 : i32
    %c0_i32_1 = arith.constant 0 : i32
    return %arg0, %arg1, %c0_i32, %c0_i32_0 : i32, i32, i32, i32
  }
}

</mosaic_0001>

<bundles_post_ra>
// kernel: tpu_custom_call.1
= control target key start
LH: loop header
LB: loop body
LE: loop exit
PB: predicated region body
PF: predicated region fallthrough
CT: control target
= control target key end

     0   :  { %8 = vsyncpa [#allocation3], 0  ;;  %s4830_s0 = inlined_call_operand.vmem [shape: bf16[2,18,18,128], index: 0, kind: input, shape index: {}]   ;;  %s4831_s1 = inlined_call_operand.vmem [shape: bf16[3,3,128,128], index: 1, kind: input, shape index: {}]   ;;  %s4832_s2 = inlined_call_operand.vmem [shape: f32[1,128], index: 2, kind: input, shape index: {}]   ;;  %s4833_s3 = inlined_call_operand.hbm [shape: bf16[2,16,16,128], index: 3, kind: output, shape index: {}]  }
   0x1   :  { %10 = vsyncpa [#allocation3 + $0x1], 0  ;;  %s3855_s12 = smov 0   ;;  %s3857_s13 = smov 0  }
   0x2   :  { %s3859_s14 = smov 0   ;;  %s3861_s15 = smov 0  }
   0x3   :  { %s3863_s16 = smov 0   ;;  %s3865_s17 = smov 0  }
   0x4   :  { %s3867_s18 = smov 0   ;;  %s3869_s19 = smov 0  }
   0x5 LB: > { %s2824_s20 = sadd.s32 4294967295, %s3831_s19   ;;  %s2825_s21 = sadd.s32 4294967294, %s3831_s19   ;;  %s3831_s19 = sphi %s3869_s19, %s16_s19   ;;  %s3827_s18 = sphi %s3867_s18, %s4846_s18   ;;  %s3823_s17 = sphi %s3865_s17, %s4845_s17   ;;  %s3819_s16 = sphi %s3863_s16, %s4844_s16   ;;  %s3815_s15 = sphi %s3861_s15, %s4843_s15   ;;  %s3811_s14 = sphi %s3859_s14, %s4842_s14   ;;  %s3807_s13 = sphi %s3857_s13, %s4841_s13   ;;  %s3803_s12 = sphi %s3855_s12, %s4840_s12  }
   0x6   : > { %s25_s22 = sadd.s32 1, %s3823_s17  ;;  %s28_s23 = sadd.s32 1, %s3827_s18 }
   0x7   : > { %p26_p0 = scmp.ge.s32.totalorder %s25_s22, 2  ;;  %p115_p1 = scmp.ne.s32.totalorder %s3811_s14, %s3807_s13 }
   0x8   : > { %p116_p2 = scmp.eq.s32.totalorder %s2824_s20, 3  ;;  %p121_p5 = scmp.ne.s32.totalorder %s3807_s13, %s3803_s12 }
   0x9   : > { %s4848_s22 = smov (%p26_p0, %s25_s22), 0  ;;  %s4850_s23 = smov (!%p26_p0, %s28_s23), %s3827_s18 }
   0xa   : > { %s101_s24 = ssub.s32 %s3823_s17, %s4848_s22  ;;  %p3906_p3 = por %p116_p2, %p115_p1 }
   0xb   : > { %p30_p4 = scmp.ge.s32.totalorder %s4850_s23, 2  ;;  %p122_p6 = scmp.eq.s32.totalorder %s2825_s21, 3 }
   0xc   : > { %p2828_p7 = scmp.ge.s32.totalorder %s3831_s19, 1  ;;  %p154_p9 = scmp.lt.s32.totalorder %s3831_s19, 5 }
   0xd   : > { %s4852_s23 = smov (%p30_p4, %s4850_s23), 0  ;;  %p3915_p8 = por %p122_p6, %p121_p5 }
   0xe   : > { %s100_s27 = ssub.s32 %s3827_s18, %s4852_s23  ;;  %s105_s28 = sadd.s32 1, %s3811_s14 }
   0xf   : > { %s102_s29 = sor.u32 %s101_s24, %s100_s27  ;;  %p155_p10 = pnand %p2828_p7, %p154_p9 }
  0x10   : > { %p103_p11 = scmp.eq.s32.totalorder %s102_s29, 0  ;;  %p178_p12 = scmp.lt.s32.totalorder (!%p155_p10), %s3819_s16, 1 }
  0x11   : > { %158 = sbr.rel (%p155_p10) target bundleno = 480 (0x1e0), region = 32  ;;  %s3574_s27 = sshll.u32 (!%p155_p10), %s3815_s15, 4 }
  0x12   : > { %s3924_s30 = scalar_select %p103_p11, %s3811_s14, %s105_s28  }
  0x13   : > { %s3477_s6 = smul.u32 (!%p155_p10), 96, %s3815_s15  ;;  %s3473_s28 = sshll.u32 (!%p155_p10), %s3819_s16, 5 }
  0x16   : > { %v3493_v0 = vld [vmem:[%s4831_s1 + $0x38] sm:$0xff]  ;;  %v3492_v1 = vld [vmem:[%s4831_s1 + $0x30] sm:$0xff]  ;;  %v3491_v2 = vld [vmem:[%s4831_s1 + $0x28] sm:$0xff]  ;;  %s179_s24 = scalar_select %p178_p12, %s3819_s16, 1  ;;  %vm409_vm0 = vsmask.f32 3328 }
  0x17   : > { %3622 = vmatpush.bf16.msra.mxu1 %v3493_v0  ;;  %3623 = vmatpush.bf16.msra.mxu2 %v3493_v0  ;;  %v3490_v3 = vld [vmem:[%s4831_s1 + $0x20] sm:$0xff]  ;;  %v3489_v4 = vld [vmem:[%s4831_s1 + $0x18] sm:$0xff]  ;;  %v3488_v5 = vld [vmem:[%s4831_s1 + $0x10] sm:$0xff]  ;;  %vm410_vm1 = vsmask.f32 7440  ;;  %vm798_vm2 = vcmask 1042432  }
  0x18   : > { %3624 = vmatpush.bf16.msra.mxu3 %v3493_v0  ;;  %320 = vmatpush.bf16.msra.mxu0 %v3493_v0  ;;  %s3646_s29 = smul.u32 216, %s179_s24  ;;  %v3487_v6 = vld [vmem:[%s4831_s1 + $0x8] sm:$0xff]  ;;  %v3486_v7 = vld [vmem:[%s4831_s1] sm:$0xff]  ;;  %v3509_v8 = vld [vmem:[%s4831_s1 + $0xb8] sm:$0xff]  ;;  %vm799_vm3 = vcmask 1046532  }
  0x19   : > { %v3501_v9 = vld [vmem:[%s4831_s1 + $0x78] sm:$0xff]  ;;  %v3508_v16 = vld [vmem:[%s4831_s1 + $0xb0] sm:$0xff]  ;;  %v3507_v23 = vld [vmem:[%s4831_s1 + $0xa8] sm:$0xff] }
  0x1a   : > { %s182_s9 = scalar_lea.vmem %s4830_s0, %s3646_s29  ;;  %v3525_v14 = vld [vmem:[%s4831_s1 + $0xf8] sm:$0xff]  ;;  %v3500_v17 = vld [vmem:[%s4831_s1 + $0x70] sm:$0xff]  ;;  %v3499_v24 = vld [vmem:[%s4831_s1 + $0x68] sm:$0xff]  ;;  %s2732_s29 = sadd.s32 %s3574_s27, %s3473_s28 }
  0x1b   : > { %3625 = vmatpush.bf16.msra.mxu1 %v3492_v1  ;;  %3626 = vmatpush.bf16.msra.mxu2 %v3492_v1  ;;  %s3956_s20 = scalar_lea.vmem %s182_s9, %s3477_s6  ;;  %v3533_v15 = vld [vmem:[%s4831_s1 + $0x138] sm:$0xff]  ;;  %v3524_v20 = vld [vmem:[%s4831_s1 + $0xf0] sm:$0xff]  ;;  %v3523_v32 = vld [vmem:[%s4831_s1 + $0xe8] sm:$0xff]  ;;  %s3474_s4 = sshll.u32 %s2732_s29, 2 }
  0x1c   : > { %3627 = vmatpush.bf16.msra.mxu3 %v3492_v1  ;;  %321 = vmatpush.bf16.msra.mxu0 %v3492_v1  ;;  %v3480_v10 = vld [vmem:[%s3956_s20 + $0x18] sm:$0xff]  ;;  %v3482_v11 = vld [vmem:[%s3956_s20 + $0x30] sm:$0xff]  ;;  %v3484_v12 = vld [vmem:[%s3956_s20 + $0x48] sm:$0xff]  ;;  %s2734_s15 = scalar_lea.hbm %s4833_s3, %s3474_s4  ;;  %s3757_s27 = scalar_lea.hbm %s4833_s3, 256 }
  0x1d   : > { %v3478_v13 = vld [vmem:[%s3956_s20] sm:$0xff]  ;;  %v3532_v21 = vld [vmem:[%s4831_s1 + $0x130] sm:$0xff]  ;;  %v3100_v22 = vld [vmem:[%s3956_s20 + $0xc] sm:$0xf]  ;;  %s2737_s7 = sshll.u32 %s2734_s15, 4  ;;  %s2738_s7 = int_to_ptr.hbm [resolvable:$true] %s2737_s7 }
  0x1e   : > { %v385_v18 = vld [vmem:[%s3956_s20] sm:$0xf]  ;;  %v3982_v19 = vld [vmem:[%s3956_s20 + $0x4] sm:$0xf]  ;;  %v3101_v27 = vld [vmem:[%s3956_s20 + $0x10] sm:$0xf] }
  0x1f   : > { %3628 = vmatpush.bf16.msra.mxu1 %v3491_v2  ;;  %3629 = vmatpush.bf16.msra.mxu2 %v3491_v2  ;;  %v413_v25 = vshrl.u32 %v385_v18, 16  ;;  %v416_v26 = vshll.u32 %v385_v18, 16  ;;  %v422_v28 = vshll.u32 %v3982_v19, 16  ;;  %v426_v29 = vshrl.u32 %v3982_v19, 16  ;;  %v3531_v33 = vld [vmem:[%s4831_s1 + $0x128] sm:$0xff]  ;;  %v3506_v36 = vld [vmem:[%s4831_s1 + $0xa0] sm:$0xff]  ;;  %vm4060_vm4 = vmor %vm409_vm0, %vm410_vm1 }
  0x20   : > { %3630 = vmatpush.bf16.msra.mxu3 %v3491_v2  ;;  %322 = vmatpush.bf16.msra.mxu0 %v3491_v2  ;;  %v1242_v30 = vshrl.u32 %v3100_v22, 16  ;;  %v1245_v31 = vshll.u32 %v3100_v22, 16  ;;  %v1251_v34 = vshll.u32 %v3101_v27, 16  ;;  %v1255_v35 = vshrl.u32 %v3101_v27, 16  ;;  %v3498_v37 = vld [vmem:[%s4831_s1 + $0x60] sm:$0xff]  ;;  %v3505_v52 = vld [vmem:[%s4831_s1 + $0x98] sm:$0xff]  ;;  %vm4074_vm5 = vmor %vm798_vm2, %vm799_vm3 }
  0x21   : > { %v415_v38 = vrot.slane %v413_v25, 4  ;;  %v418_v39 = vrot.slane %v416_v26, 5  ;;  %v4012_v40 = vrot.slane %v422_v28, 5  ;;  %v428_v41 = vrot.slane %v426_v29, 4  ;;  %v3522_v42 = vld [vmem:[%s4831_s1 + $0xe0] sm:$0xff]  ;;  %v3497_v53 = vld [vmem:[%s4831_s1 + $0x58] sm:$0xff] }
  0x22   : > { %v4018_v43 = vld [vmem:[%s3956_s20 + $0x8] sm:$0x1]  ;;  %v1244_v44 = vrot.slane %v1242_v30, 4  ;;  %v1247_v45 = vrot.slane %v1245_v31, 5  ;;  %v3530_v46 = vld [vmem:[%s4831_s1 + $0x120] sm:$0xff]  ;;  %v4025_v49 = vrot.slane %v1251_v34, 5 }
  0x23   : > { %3631 = vmatpush.bf16.msra.mxu1 %v3490_v3  ;;  %3632 = vmatpush.bf16.msra.mxu2 %v3490_v3  ;;  %v3481_v47 = vld [vmem:[%s3956_s20 + $0x24] sm:$0xff]  ;;  %v3102_v48 = vld [vmem:[%s3956_s20 + $0x14] sm:$0x1]  ;;  %v1257_v50 = vrot.slane %v1255_v35, 4  ;;  %v3483_v51 = vld [vmem:[%s3956_s20 + $0x3c] sm:$0xff]  ;;  %v419_v54 = vor.u32 %v418_v39, %v415_v38  ;;  %v429_v58 = vor.u32 %v428_v41, %v4012_v40  ;;  %v432_v59 = vshll.u32 %v4018_v43, 16 }
  0x24   : > { %3633 = vmatpush.bf16.msra.mxu3 %v3490_v3  ;;  %323 = vmatpush.bf16.msra.mxu0 %v3490_v3  ;;  %v3485_v55 = vld [vmem:[%s3956_s20 + $0x54] sm:$0xff]  ;;  %v3479_v57 = vld [vmem:[%s3956_s20 + $0xc] sm:$0xff]  ;;  %v803_v60 = vrot.slane %v3982_v19, 5  ;;  %v766_v63 = vld [vmem:[%s3956_s20] sm:$0xe]  ;;  %v1248_v0 = vor.u32 %v1247_v45, %v1244_v44  ;;  %v1261_v1 = vshll.u32 %v3102_v48, 16 }
  0x25   : > { %v3521_v56 = vld [vmem:[%s4831_s1 + $0xd8] sm:$0xff]  ;;  %v3504_v62 = vld [vmem:[%s4831_s1 + $0x90] sm:$0xff]  ;;  %v1258_v2 = vor.u32 %v1257_v50, %v4025_v49  ;;  %v388_v3 = vld [vmem:[%s3956_s20 + $0xc] sm:$0xf]  ;;  %s3751_s9 = sshra.s32 %s2738_s7, 4  ;;  %s3752_s9 = int_to_ptr.hbm [resolvable:$true] %s3751_s9 }
  0x26   : > { %v3529_v61 = vld [vmem:[%s4831_s1 + $0x118] sm:$0xff]  ;;  %v3520_v18 = vld [vmem:[%s4831_s1 + $0xd0] sm:$0xff]  ;;  %v440_v22 = vshll.u32 %v388_v3, 16  ;;  %v3503_v25 = vld [vmem:[%s4831_s1 + $0x88] sm:$0xff]  ;;  %s3753_s10 = scalar_lea.hbm %s3752_s9, 64  ;;  %p3758_p2 = scmp.lt.s32.totalorder %s3752_s9, %s4833_s3 }
  0x27   : > { %3634 = vmatpush.bf16.msra.mxu1 %v3489_v4  ;;  %3635 = vmatpush.bf16.msra.mxu2 %v3489_v4  ;;  %v3528_v19 = vld [vmem:[%s4831_s1 + $0x110] sm:$0xff]  ;;  %v3495_v26 = vld [vmem:[%s4831_s1 + $0x48] sm:$0xff]  ;;  %v3502_v44 = vld [vmem:[%s4831_s1 + $0x80] sm:$0xff]  ;;  %p3754_p13 = scmp.ne.s32.totalorder %s3752_s9, %s3753_s10  ;;  %p3759_p4 = scmp.lt.s32.totalorder %s3757_s27, %s3753_s10 }
  0x28   : > { %3636 = vmatpush.bf16.msra.mxu3 %v3489_v4  ;;  %324 = vmatpush.bf16.msra.mxu0 %v3489_v4  ;;  %v3496_v4 = vld [vmem:[%s4831_s1 + $0x50] sm:$0xff]  ;;  %v3527_v38 = vld [vmem:[%s4831_s1 + $0x108] sm:$0xff]  ;;  %v442_v41 = vrot.slane %v440_v22, 5  ;;  %v3494_v45 = vld [vmem:[%s4831_s1 + $0x40] sm:$0xff] }
  0x29   : > { %p3755_p0 = pnand %p3754_p13, %p3906_p3  ;;  %p3760_p5 = por %p3759_p4, %p3758_p2 }
  0x2b   : > { %3637 = vmatpush.bf16.msra.mxu1 %v3488_v5  ;;  %3638 = vmatpush.bf16.msra.mxu2 %v3488_v5  ;;  %p3756_p1 = pneg %p3755_p0 }
  0x2c   : > { %3639 = vmatpush.bf16.msra.mxu3 %v3488_v5  ;;  %325 = vmatpush.bf16.msra.mxu0 %v3488_v5  ;;  %v420_v5 = vrot.slane %v419_v54, 4 }
  0x2d   : > { %p3761_p6 = pnand %p3760_p5, %p3756_p1 }
  0x2e   : > { %v425_v29 = vsel %vm4060_vm4, %v420_v5, %v4012_v40  ;;  %v4107_v40 = vld [vmem:[%s3956_s20 + $0x14] sm:$0x1] }
  0x2f   : > { %3640 = vmatpush.bf16.msra.mxu1 %v3487_v6  ;;  %3641 = vmatpush.bf16.msra.mxu2 %v3487_v6  ;;  %v813_v22 = vrot.slane %v4107_v40, 5 }
  0x30   : > { %3642 = vmatpush.bf16.msra.mxu3 %v3487_v6  ;;  %326 = vmatpush.bf16.msra.mxu0 %v3487_v6  ;;  %v4055_v6 = vld [vmem:[%s3956_s20 + $0x10] sm:$0xf] }
  0x33   : > { %3643 = vmatpush.bf16.msra.mxu1 %v3486_v7  ;;  %3644 = vmatpush.bf16.msra.mxu2 %v3486_v7 }
  0x34   : > { %3645 = vmatpush.bf16.msra.mxu3 %v3486_v7  ;;  %327 = vmatpush.bf16.msra.mxu0 %v3486_v7  ;;  %v430_v7 = vrot.slane %v429_v58, 4  ;;  %v456_v58 = vshll.u32 %v4107_v40, 16  ;;  %v3563_v40 = vld [vmem:[%s4831_s1 + $0x1e8] sm:$0xff] }
  0x36   : > { %338 = vmatmul.bf16.vlgmr.msra.gmra.mxu1 %v3480_v10  ;;  %348 = vmatmul.bf16.vlgmr.msra.gmra.mxu2 %v3482_v11  ;;  %v805_v10 = vrot.slane %v803_v60, 4  ;;  %v3103_v11 = vld [vmem:[%s3956_s20 + $0x18] sm:$0xf] }
  0x37   : > { %954 = vmatpush.bf16.msrb.mxu2 %v3509_v8  ;;  %701 = vmatpush.bf16.msrb.mxu1 %v3501_v9  ;;  %v434_v8 = vrot.slane %v432_v59, 5  ;;  %v2946_v9 = vrot.slane %v766_v63, 9  ;;  %v1266_v27 = vshrl.u32 %v3103_v11, 16  ;;  %v1269_v28 = vshll.u32 %v3103_v11, 16  ;;  %v3105_v59 = vld [vmem:[%s3956_s20 + $0x20] sm:$0x1] }
  0x38   : > { %358 = vmatmul.bf16.vlgmr.msra.gmra.mxu3 %v3484_v12  ;;  %328 = vmatmul.bf16.vlgmr.msra.gmra.mxu0 %v3478_v13  ;;  %v806_v13 = vrot.slane %v4018_v43, 5 }
  0x39   : > { %1152 = vmatpush.bf16.msrb.mxu3 %v3525_v14  ;;  %1530 = vmatpush.bf16.msrb.mxu0 %v3533_v15  ;;  %v1249_v14 = vrot.slane %v1248_v0, 4  ;;  %v1263_v15 = vrot.slane %v1261_v1, 5  ;;  %v435_v30 = vsel %vm4060_vm4, %v430_v7, %v434_v8  ;;  %v804_v34 = vsel %vm4074_vm5, %v2946_v9, %v803_v60  ;;  %v3518_v60 = vld [vmem:[%s4831_s1 + $0xc0] sm:$0xff]  ;;  %v3565_v0 = vld [vmem:[%s4831_s1 + $0x1f8] sm:$0xff]  ;;  %v767_v7 = vld [vmem:[%s3956_s20 + $0xc] sm:$0xe] }
  0x3a   : > { %v807_v35 = vsel %vm4074_vm5, %v805_v10, %v806_v13  ;;  %v1268_v48 = vrot.slane %v1266_v27, 4  ;;  %v874_v50 = vunpack.c.l.b16 %v804_v34  ;;  %v3573_v1 = vld [vmem:[%s4831_s1 + $0x238] sm:$0xff]  ;;  %v1285_v9 = vshll.u32 %v3105_v59, 16  ;;  %v3510_v10 = vld [vmem:[%s3956_s20 + $0xc] sm:$0xff]  ;;  %v3106_v34 = vld [vmem:[%s3956_s20 + $0x24] sm:$0xf] }
  0x3b   : > { %955 = vmatpush.bf16.msrb.mxu2 %v3508_v16  ;;  %702 = vmatpush.bf16.msrb.mxu1 %v3500_v17  ;;  %v437_v16 = vshrl.u32 %v388_v3, 16  ;;  %v3104_v17 = vld [vmem:[%s3956_s20 + $0x1c] sm:$0xf]  ;;  %v458_v13 = vrot.slane %v456_v58, 5 }
  0x3c   : > { %v1275_v31 = vshll.u32 %v3104_v17, 16  ;;  %v1287_v27 = vrot.slane %v1285_v9, 5  ;;  %v3511_v9 = vld [vmem:[%s3956_s20 + $0x18] sm:$0xff] }
  0x3d   : > { %1153 = vmatpush.bf16.msrb.mxu3 %v3524_v20  ;;  %1531 = vmatpush.bf16.msrb.mxu0 %v3532_v21  ;;  %v1259_v21 = vrot.slane %v1258_v2, 4  ;;  %v810_v2 = vrot.slane %v4055_v6, 5 }
  0x3e   : > { %v4123_v54 = vrot.slane %v1275_v31, 5 }
  0x3f   : > { %956 = vmatpush.bf16.msrb.mxu2 %v3507_v23  ;;  %703 = vmatpush.bf16.msrb.mxu1 %v3499_v24  ;;  %v446_v23 = vshll.u32 %v4055_v6, 16  ;;  %v450_v24 = vshrl.u32 %v4055_v6, 16  ;;  %v1264_v39 = vsel %vm4060_vm4, %v1259_v21, %v1263_v15  ;;  %v3556_v6 = vld [vmem:[%s4831_s1 + $0x1b0] sm:$0xff]  ;;  %v812_v21 = vrot.slane %v810_v2, 4 }
  0x41   : > { %1154 = vmatpush.bf16.msrb.mxu3 %v3523_v32  ;;  %1532 = vmatpush.bf16.msrb.mxu0 %v3531_v33  ;;  %v1279_v32 = vshrl.u32 %v3104_v17, 16  ;;  %v3519_v33 = vld [vmem:[%s4831_s1 + $0xc8] sm:$0xff]  ;;  %v452_v43 = vrot.slane %v450_v24, 4  ;;  %v3540_v17 = vld [vmem:[%s4831_s1 + $0x170] sm:$0xff] }
  0x42   : > { %v3564_v24 = vld [vmem:[%s4831_s1 + $0x1f0] sm:$0xff] }
  0x43   : > { %957 = vmatpush.bf16.msrb.mxu2 %v3506_v36  ;;  %704 = vmatpush.bf16.msrb.mxu1 %v3498_v37  ;;  %v1254_v36 = vsel %vm4060_vm4, %v1249_v14, %v4025_v49  ;;  %v439_v37 = vrot.slane %v437_v16, 4  ;;  %v1271_v49 = vrot.slane %v1269_v28, 5  ;;  %v391_v14 = vld [vmem:[%s3956_s20 + $0x18] sm:$0xf] }
  0x44   : > { %v461_v28 = vshrl.u32 %v391_v14, 16 }
  0x45   : > { %1155 = vmatpush.bf16.msrb.mxu3 %v3522_v42  ;;  %1533 = vmatpush.bf16.msrb.mxu0 %v3530_v46  ;;  %v4109_v42 = vrot.slane %v446_v23, 5  ;;  %v621_v46 = vunpack.c.l.b16 %v425_v29  ;;  %v1272_v3 = vor.u32 %v1271_v49, %v1268_v48  ;;  %v464_v29 = vshll.u32 %v391_v14, 16 }
  0x46   : > { %343 = vmatmul.bf16.gmra.mxu1 %v3481_v47  ;;  %353 = vmatmul.bf16.gmra.mxu2 %v3483_v51  ;;  %v622_v47 = vunpack.c.l.b16 %v435_v30  ;;  %v875_v51 = vunpack.c.l.b16 %v807_v35  ;;  %v3539_v35 = vld [vmem:[%s4831_s1 + $0x168] sm:$0xff]  ;;  %v1290_v49 = vshrl.u32 %v3106_v34, 16 }
  0x47   : > { %958 = vmatpush.bf16.msrb.mxu2 %v3505_v52  ;;  %705 = vmatpush.bf16.msrb.mxu1 %v3497_v53  ;;  %v3557_v52 = vld [vmem:[%s4831_s1 + $0x1b8] sm:$0xff]  ;;  %v453_v63 = vor.u32 %v452_v43, %v4109_v42  ;;  %v1273_v23 = vrot.slane %v1272_v3, 4  ;;  %v3108_v3 = vld [vmem:[%s3956_s20 + $0x2c] sm:$0x1] }
  0x48   : > { %363 = vmatmul.bf16.gmra.mxu3 %v3485_v55  ;;  %333 = vmatmul.bf16.gmra.mxu0 %v3479_v57  ;;  %v3541_v53 = vld [vmem:[%s4831_s1 + $0x178] sm:$0xff]  ;;  %v1281_v55 = vrot.slane %v1279_v32, 4  ;;  %v1451_v57 = vunpack.c.l.b16 %v1264_v39  ;;  %v890_v5 = vpack.c.b16 %v875_v51, %v874_v50  ;;  %v3107_v39 = vld [vmem:[%s3956_s20 + $0x28] sm:$0xf]  ;;  %v1293_v50 = vshll.u32 %v3106_v34, 16  ;;  %v3570_v34 = vld [vmem:[%s4831_s1 + $0x220] sm:$0xff] }
  0x49   : > { %1156 = vmatpush.bf16.msrb.mxu3 %v3521_v56  ;;  %1534 = vmatpush.bf16.msrb.mxu0 %v3529_v61  ;;  %v1450_v56 = vunpack.c.l.b16 %v1254_v36  ;;  %v3526_v61 = vld [vmem:[%s4831_s1 + $0x100] sm:$0xff]  ;;  %v454_v16 = vrot.slane %v453_v63, 4  ;;  %v1299_v51 = vshll.u32 %v3107_v39, 16 }
  0x4a   : > { %v1282_v8 = vor.u32 %v1281_v55, %v4123_v54  ;;  %v1295_v63 = vrot.slane %v1293_v50, 5 }
  0x4b   : > { %959 = vmatpush.bf16.msrb.mxu2 %v3504_v62  ;;  %706 = vmatpush.bf16.msrb.mxu1 %v3496_v4  ;;  %v443_v62 = vor.u32 %v442_v41, %v439_v37  ;;  %v637_v4 = vpack.c.b16 %v622_v47, %v621_v46  ;;  %v1466_v11 = vpack.c.b16 %v1451_v57, %v1450_v56  ;;  %v3571_v41 = vld [vmem:[%s4831_s1 + $0x228] sm:$0xff]  ;;  %v393_v46 = vld [vmem:[%s3956_s20 + $0x20] sm:$0x1] }
  0x4c   : > { %v459_v36 = vsel %vm4060_vm4, %v454_v16, %v458_v13  ;;  %v480_v59 = vshll.u32 %v393_v46, 16  ;;  %v1309_v16 = vshll.u32 %v3108_v3, 16  ;;  %v769_v3 = vld [vmem:[%s3956_s20 + $0x24] sm:$0xe] }
  0x4d   : > { %1157 = vmatpush.bf16.msrb.mxu3 %v3520_v18  ;;  %1535 = vmatpush.bf16.msrb.mxu0 %v3528_v19  ;;  %v444_v15 = vrot.slane %v443_v62, 4  ;;  %v4152_v18 = vld [vmem:[%s3956_s20 + $0x1c] sm:$0xf]  ;;  %v2947_v19 = vrot.slane %v767_v7, 9  ;;  %v624_v55 = vunpack.c.l.b16 %v459_v36  ;;  %v1292_v62 = vrot.slane %v1290_v49, 4 }
  0x4e   : > { %v470_v30 = vshll.u32 %v4152_v18, 16  ;;  %v474_v31 = vshrl.u32 %v4152_v18, 16  ;;  %v482_v13 = vrot.slane %v480_v59, 5 }
  0x4f   : > { %960 = vmatpush.bf16.msrb.mxu2 %v3503_v25  ;;  %707 = vmatpush.bf16.msrb.mxu1 %v3495_v26  ;;  %v3572_v25 = vld [vmem:[%s4831_s1 + $0x230] sm:$0xff]  ;;  %v1283_v26 = vrot.slane %v1282_v8, 4  ;;  %v449_v32 = vsel %vm4060_vm4, %v444_v15, %v4109_v42  ;;  %v811_v37 = vsel %vm4074_vm5, %v2947_v19, %v810_v2  ;;  %v1278_v42 = vsel %vm4060_vm4, %v1273_v23, %v4123_v54  ;;  %v768_v8 = vld [vmem:[%s3956_s20 + $0x18] sm:$0xe]  ;;  %v394_v19 = vld [vmem:[%s3956_s20 + $0x24] sm:$0xf] }
  0x50   : > { %v4192_v47 = vrot.slane %v470_v30, 5  ;;  %v476_v48 = vrot.slane %v474_v31, 4  ;;  %v876_v56 = vunpack.c.l.b16 %v811_v37  ;;  %v1452_v57 = vunpack.c.l.b16 %v1278_v42  ;;  %v3110_v23 = vld [vmem:[%s3956_s20 + $0x34] sm:$0xf] }
  0x51   : > { %1158 = vmatpush.bf16.msrb.mxu3 %v3519_v33  ;;  %1536 = vmatpush.bf16.msrb.mxu0 %v3527_v38  ;;  %v3555_v33 = vld [vmem:[%s4831_s1 + $0x1a8] sm:$0xff]  ;;  %v814_v38 = vsel %vm4074_vm5, %v812_v21, %v813_v22  ;;  %v1288_v43 = vsel %vm4060_vm4, %v1283_v26, %v1287_v27  ;;  %v817_v2 = vrot.slane %v4152_v18, 5  ;;  %v1296_v14 = vor.u32 %v1295_v63, %v1292_v62  ;;  %v3109_v22 = vld [vmem:[%s3956_s20 + $0x30] sm:$0xf]  ;;  %v3554_v27 = vld [vmem:[%s4831_s1 + $0x1a0] sm:$0xff] }
  0x52   : > { %v877_v54 = vunpack.c.l.b16 %v814_v38  ;;  %v1453_v58 = vunpack.c.l.b16 %v1288_v43  ;;  %v820_v18 = vrot.slane %v393_v46, 5  ;;  %v4204_v21 = vld [vmem:[%s3956_s20 + $0x28] sm:$0xf]  ;;  %v1311_v31 = vrot.slane %v1309_v16, 5 }
  0x53   : > { %961 = vmatpush.bf16.msrb.mxu2 %v3502_v44  ;;  %708 = vmatpush.bf16.msrb.mxu1 %v3494_v45  ;;  %v463_v44 = vrot.slane %v461_v28, 4  ;;  %v466_v45 = vrot.slane %v464_v29, 5  ;;  %v1297_v26 = vrot.slane %v1296_v14, 4  ;;  %v3562_v28 = vld [vmem:[%s4831_s1 + $0x1e0] sm:$0xff]  ;;  %v494_v37 = vshll.u32 %v4204_v21, 16 }
  0x54   : > { %v1467_v7 = vpack.c.b16 %v1453_v58, %v1452_v57  ;;  %v3538_v29 = vld [vmem:[%s4831_s1 + $0x160] sm:$0xff]  ;;  %v498_v38 = vshrl.u32 %v4204_v21, 16  ;;  %v1327_v42 = vshrl.u32 %v3110_v23, 16  ;;  %v4249_v14 = vld [vmem:[%s3956_s20 + $0x34] sm:$0xf]  ;;  %v2949_v16 = vrot.slane %v769_v3, 9 }
  0x55   : > { %1159 = vmatpush.bf16.msrb.mxu3 %v3518_v60  ;;  %1537 = vmatpush.bf16.msrb.mxu0 %v3526_v61  ;;  %v467_v60 = vor.u32 %v466_v45, %v463_v44  ;;  %v477_v61 = vor.u32 %v476_v48, %v4192_v47  ;;  %v831_v3 = vrot.slane %v4249_v14, 5 }
  0x56   : > { %709 = vmatmul.bf16.vlgmr.msrb.gmra.mxu1 %v637_v4  ;;  %962 = vmatmul.bf16.vlgmr.msrb.gmra.mxu2 %v890_v5  ;;  %v891_v5 = vpack.c.b16 %v877_v54, %v876_v56  ;;  %v1329_v57 = vrot.slane %v1327_v42, 4  ;;  %v4284_v42 = vld [vmem:[%s3956_s20 + $0x38] sm:$0x1] }
  0x57   : > { %1978 = vmatpush.bf16.msra.mxu2 %v3557_v52  ;;  %1780 = vmatpush.bf16.msra.mxu1 %v3541_v53  ;;  %v1303_v52 = vshrl.u32 %v3107_v39, 16  ;;  %v623_v53 = vunpack.c.l.b16 %v449_v32  ;;  %v485_v32 = vshrl.u32 %v394_v19, 16  ;;  %v1314_v39 = vshrl.u32 %v3109_v22, 16 }
  0x58   : > { %1160 = vmatmul.bf16.vlgmr.msrb.gmra.mxu3 %v3510_v10  ;;  %1538 = vmatmul.bf16.vlgmr.msrb.gmra.mxu0 %v1466_v11  ;;  %v468_v10 = vrot.slane %v467_v60, 4  ;;  %v478_v11 = vrot.slane %v477_v61, 4  ;;  %v3111_v60 = vld [vmem:[%s3956_s20 + $0x38] sm:$0x1] }
  0x59   : > { %2356 = vmatpush.bf16.msra.mxu3 %v3565_v0  ;;  %2606 = vmatpush.bf16.msra.mxu0 %v3573_v1  ;;  %v4195_v0 = vrot.slane %v1299_v51, 5  ;;  %v1305_v1 = vrot.slane %v1303_v52, 4  ;;  %v638_v4 = vpack.c.b16 %v624_v55, %v623_v53  ;;  %v396_v51 = vld [vmem:[%s3956_s20 + $0x2c] sm:$0x1]  ;;  %v4237_v52 = vrot.slane %v494_v37, 5 }
  0x5a   : > { %v500_v53 = vrot.slane %v498_v38, 4  ;;  %v1316_v55 = vrot.slane %v1314_v39, 4  ;;  %v504_v62 = vshll.u32 %v396_v51, 16 }
  0x5b   : > { %1979 = vmatpush.bf16.msra.mxu2 %v3556_v6  ;;  %1781 = vmatpush.bf16.msra.mxu1 %v3540_v17  ;;  %v1306_v15 = vor.u32 %v1305_v1, %v4195_v0  ;;  %v2948_v6 = vrot.slane %v768_v8, 9  ;;  %v819_v17 = vrot.slane %v817_v2, 4  ;;  %v1302_v45 = vsel %vm4060_vm4, %v1297_v26, %v4195_v0  ;;  %v3512_v8 = vld [vmem:[%s3956_s20 + $0x24] sm:$0xff]  ;;  %v3553_v26 = vld [vmem:[%s4831_s1 + $0x198] sm:$0xff] }
  0x5c   : > { %v1454_v58 = vunpack.c.l.b16 %v1302_v45  ;;  %v501_v0 = vor.u32 %v500_v53, %v4237_v52  ;;  %v824_v1 = vrot.slane %v4204_v21, 5 }
  0x5d   : > { %2357 = vmatpush.bf16.msra.mxu3 %v3564_v24  ;;  %2607 = vmatpush.bf16.msra.mxu0 %v3572_v25  ;;  %v473_v24 = vsel %vm4060_vm4, %v468_v10, %v4192_v47  ;;  %v483_v25 = vsel %vm4060_vm4, %v478_v11, %v482_v13  ;;  %v1307_v30 = vrot.slane %v1306_v15, 4  ;;  %v821_v36 = vsel %vm4074_vm5, %v819_v17, %v820_v18  ;;  %v397_v10 = vld [vmem:[%s3956_s20 + $0x30] sm:$0xf] }
  0x5e   : > { %v625_v43 = vunpack.c.l.b16 %v473_v24  ;;  %v626_v44 = vunpack.c.l.b16 %v483_v25  ;;  %v487_v47 = vrot.slane %v485_v32, 4  ;;  %v879_v50 = vunpack.c.l.b16 %v821_v36 }
  0x5f   : > { %1980 = vmatpush.bf16.msra.mxu2 %v3555_v33  ;;  %1782 = vmatpush.bf16.msra.mxu1 %v3539_v35  ;;  %v488_v33 = vshll.u32 %v394_v19, 16  ;;  %v818_v35 = vsel %vm4074_vm5, %v2948_v6, %v817_v2  ;;  %v1312_v46 = vsel %vm4060_vm4, %v1307_v30, %v1311_v31  ;;  %v506_v13 = vrot.slane %v504_v62, 5 }
  0x60   : > { %v878_v49 = vunpack.c.l.b16 %v818_v35  ;;  %v1455_v59 = vunpack.c.l.b16 %v1312_v46  ;;  %v639_v63 = vpack.c.b16 %v626_v44, %v625_v43  ;;  %v502_v15 = vrot.slane %v501_v0, 4 }
  0x61   : > { %2358 = vmatpush.bf16.msra.mxu3 %v3563_v40  ;;  %2608 = vmatpush.bf16.msra.mxu0 %v3571_v41  ;;  %v1317_v40 = vshll.u32 %v3109_v22, 16  ;;  %v1323_v41 = vshll.u32 %v3110_v23, 16  ;;  %v490_v48 = vrot.slane %v488_v33, 5  ;;  %v826_v6 = vrot.slane %v824_v1, 4  ;;  %v3112_v33 = vld [vmem:[%s3956_s20 + $0x3c] sm:$0xf] }
  0x62   : > { %v892_v2 = vpack.c.b16 %v879_v50, %v878_v49  ;;  %v827_v17 = vrot.slane %v396_v51, 5  ;;  %v509_v22 = vshrl.u32 %v397_v10, 16  ;;  %v512_v23 = vshll.u32 %v397_v10, 16  ;;  %v400_v10 = vld [vmem:[%s3956_s20 + $0x3c] sm:$0xf] }
  0x63   : > { %1981 = vmatpush.bf16.msra.mxu2 %v3554_v27  ;;  %1783 = vmatpush.bf16.msra.mxu1 %v3538_v29  ;;  %v1319_v56 = vrot.slane %v1317_v40, 5  ;;  %v4239_v54 = vrot.slane %v1323_v41, 5  ;;  %v491_v61 = vor.u32 %v490_v48, %v487_v47  ;;  %v518_v24 = vshll.u32 %v4249_v14, 16  ;;  %v3561_v27 = vld [vmem:[%s4831_s1 + $0x1d8] sm:$0xff] }
  0x64   : > { %v522_v25 = vshrl.u32 %v4249_v14, 16  ;;  %v3569_v29 = vld [vmem:[%s4831_s1 + $0x218] sm:$0xff]  ;;  %v507_v31 = vsel %vm4060_vm4, %v502_v15, %v506_v13  ;;  %v825_v32 = vsel %vm4074_vm5, %v2949_v16, %v824_v1  ;;  %v828_v35 = vsel %vm4074_vm5, %v826_v6, %v827_v17  ;;  %v3115_v13 = vld [vmem:[%s3956_s20 + $0x48] sm:$0xf]  ;;  %v3552_v17 = vld [vmem:[%s4831_s1 + $0x190] sm:$0xff] }
  0x65   : > { %2359 = vmatpush.bf16.msra.mxu3 %v3562_v28  ;;  %2609 = vmatpush.bf16.msra.mxu0 %v3570_v34  ;;  %v492_v11 = vrot.slane %v491_v61, 4  ;;  %v3537_v28 = vld [vmem:[%s4831_s1 + $0x158] sm:$0xff]  ;;  %v3113_v34 = vld [vmem:[%s3956_s20 + $0x40] sm:$0xf]  ;;  %v511_v38 = vrot.slane %v509_v22, 4  ;;  %v514_v39 = vrot.slane %v512_v23, 5  ;;  %v628_v48 = vunpack.c.l.b16 %v507_v31 }
  0x66   : > { %714 = vmatmul.bf16.gmra.mxu1 %v638_v4  ;;  %967 = vmatmul.bf16.gmra.mxu2 %v891_v5  ;;  %v1320_v4 = vor.u32 %v1319_v56, %v1316_v55  ;;  %v1330_v5 = vor.u32 %v1329_v57, %v4239_v54  ;;  %v4281_v40 = vrot.slane %v518_v24, 5  ;;  %v524_v41 = vrot.slane %v522_v25, 4  ;;  %v3116_v25 = vld [vmem:[%s3956_s20 + $0x4c] sm:$0xf] }
  0x67   : > { %v497_v30 = vsel %vm4060_vm4, %v492_v11, %v4237_v52  ;;  %1982 = vmatpush.bf16.msra.mxu2 %v3553_v26  ;;  %1784 = vmatpush.bf16.msra.mxu1 %v3537_v28  ;;  %v1338_v43 = vshrl.u32 %v3112_v33, 16  ;;  %v1341_v44 = vshll.u32 %v3112_v33, 16  ;;  %v1347_v45 = vshll.u32 %v3113_v34, 16  ;;  %v4294_v11 = vld [vmem:[%s3956_s20 + $0x40] sm:$0xf]  ;;  %v3568_v26 = vld [vmem:[%s4831_s1 + $0x210] sm:$0xff] }
  0x68   : > { %1165 = vmatmul.bf16.gmra.mxu3 %v3511_v9  ;;  %1543 = vmatmul.bf16.gmra.mxu0 %v1467_v7  ;;  %v1333_v7 = vshll.u32 %v3111_v60, 16  ;;  %v1468_v9 = vpack.c.b16 %v1455_v59, %v1454_v58  ;;  %v1321_v18 = vrot.slane %v1320_v4, 4  ;;  %v1331_v19 = vrot.slane %v1330_v5, 4  ;;  %v3114_v60 = vld [vmem:[%s3956_s20 + $0x44] sm:$0x1] }
  0x69   : > { %2360 = vmatpush.bf16.msra.mxu3 %v3561_v27  ;;  %2610 = vmatpush.bf16.msra.mxu0 %v3569_v29  ;;  %v1351_v46 = vshrl.u32 %v3113_v34, 16  ;;  %v627_v47 = vunpack.c.l.b16 %v497_v30  ;;  %v880_v49 = vunpack.c.l.b16 %v825_v32  ;;  %v881_v50 = vunpack.c.l.b16 %v828_v35  ;;  %v770_v5 = vld [vmem:[%s3956_s20 + $0x30] sm:$0xe] }
  0x6a   : > { %v1335_v21 = vrot.slane %v1333_v7, 5  ;;  %v1326_v36 = vsel %vm4060_vm4, %v1321_v18, %v4239_v54  ;;  %v515_v53 = vor.u32 %v514_v39, %v511_v38  ;;  %v525_v55 = vor.u32 %v524_v41, %v4281_v40  ;;  %v3560_v18 = vld [vmem:[%s4831_s1 + $0x1d0] sm:$0xff]  ;;  %v402_v41 = vld [vmem:[%s3956_s20 + $0x44] sm:$0x1] }
  0x6b   : > { %v1456_v51 = vunpack.c.l.b16 %v1326_v36  ;;  %v528_v56 = vshll.u32 %v4284_v42, 16  ;;  %v1340_v54 = vrot.slane %v1338_v43, 4  ;;  %v1343_v57 = vrot.slane %v1341_v44, 5  ;;  %1983 = vmatpush.bf16.msra.mxu2 %v3552_v17  ;;  %v3559_v17 = vld [vmem:[%s4831_s1 + $0x1c8] sm:$0xff] }
  0x6c   : > { %v1336_v37 = vsel %vm4060_vm4, %v1331_v19, %v1335_v21  ;;  %v1349_v58 = vrot.slane %v1347_v45, 5  ;;  %v1353_v59 = vrot.slane %v1351_v46, 4  ;;  %v640_v61 = vpack.c.b16 %v628_v48, %v627_v47  ;;  %v3536_v19 = vld [vmem:[%s4831_s1 + $0x150] sm:$0xff] }
  0x6d   : > { %v1457_v52 = vunpack.c.l.b16 %v1336_v37  ;;  %v893_v62 = vpack.c.b16 %v881_v50, %v880_v49  ;;  %v516_v1 = vrot.slane %v515_v53, 4  ;;  %v526_v4 = vrot.slane %v525_v55, 4  ;;  %2361 = vmatpush.bf16.msra.mxu3 %v3560_v18  ;;  %1785 = vmatpush.bf16.msra.mxu1 %v3536_v19 }
  0x6e   : > { %v1344_v7 = vor.u32 %v1343_v57, %v1340_v54  ;;  %v2950_v16 = vrot.slane %v770_v5, 9  ;;  %v833_v14 = vrot.slane %v831_v3, 4  ;;  %v834_v6 = vrot.slane %v4284_v42, 5  ;;  %2611 = vmatpush.bf16.msra.mxu0 %v3568_v26 }
  0x6f   : > { %v1469_v0 = vpack.c.b16 %v1457_v52, %v1456_v51  ;;  %v521_v15 = vsel %vm4060_vm4, %v516_v1, %v4281_v40  ;;  %v533_v27 = vshrl.u32 %v400_v10, 16  ;;  %v536_v28 = vshll.u32 %v400_v10, 16 }
  0x70   : > { %v1345_v22 = vrot.slane %v1344_v7, 4  ;;  %v542_v29 = vshll.u32 %v4294_v11, 16  ;;  %v546_v30 = vshrl.u32 %v4294_v11, 16  ;;  %v1362_v31 = vshrl.u32 %v3115_v13, 16  ;;  %v403_v7 = vld [vmem:[%s3956_s20 + $0x48] sm:$0xf] }
  0x71   : > { %v1365_v32 = vshll.u32 %v3115_v13, 16  ;;  %v832_v33 = vsel %vm4074_vm5, %v2950_v16, %v831_v3  ;;  %v835_v34 = vsel %vm4074_vm5, %v833_v14, %v834_v6  ;;  %v1371_v35 = vshll.u32 %v3116_v25, 16  ;;  %v3551_v14 = vld [vmem:[%s4831_s1 + $0x188] sm:$0xff]  ;;  %v3118_v6 = vld [vmem:[%s3956_s20 + $0x54] sm:$0xf]  ;;  %2362 = vmatpush.bf16.msra.mxu3 %v3559_v17 }
  0x72   : > { %v1375_v36 = vshrl.u32 %v3116_v25, 16  ;;  %v629_v37 = vunpack.c.l.b16 %v521_v15  ;;  %v1350_v39 = vsel %vm4060_vm4, %v1345_v22, %v1349_v58  ;;  %v535_v42 = vrot.slane %v533_v27, 4  ;;  %1984 = vmatpush.bf16.msra.mxu2 %v3551_v14 }
  0x73   : > { %v538_v43 = vrot.slane %v536_v28, 5  ;;  %v4327_v44 = vrot.slane %v542_v29, 5  ;;  %v548_v45 = vrot.slane %v546_v30, 4  ;;  %v882_v46 = vunpack.c.l.b16 %v832_v33 }
  0x74   : > { %v883_v47 = vunpack.c.l.b16 %v835_v34  ;;  %v1364_v48 = vrot.slane %v1362_v31, 4  ;;  %v1367_v49 = vrot.slane %v1365_v32, 5  ;;  %v1458_v50 = vunpack.c.l.b16 %v1350_v39  ;;  %v3535_v34 = vld [vmem:[%s4831_s1 + $0x148] sm:$0xff] }
  0x75   : > { %v4329_v52 = vrot.slane %v1371_v35, 5  ;;  %v1377_v53 = vrot.slane %v1375_v36, 4  ;;  %v552_v55 = vshll.u32 %v402_v41, 16  ;;  %v539_v54 = vor.u32 %v538_v43, %v535_v42  ;;  %1786 = vmatpush.bf16.msra.mxu1 %v3535_v34 }
  0x76   : > { %719 = vmatmul.bf16.gmra.mxu1 %v639_v63  ;;  %972 = vmatmul.bf16.gmra.mxu2 %v892_v2  ;;  %v3513_v63 = vld [vmem:[%s3956_s20 + $0x30] sm:$0xff]  ;;  %v530_v2 = vrot.slane %v528_v56, 5  ;;  %v549_v57 = vor.u32 %v548_v45, %v4327_v44  ;;  %v557_v18 = vshrl.u32 %v403_v7, 16  ;;  %v560_v19 = vshll.u32 %v403_v7, 16 }
  0x77   : > { %v3117_v56 = vld [vmem:[%s3956_s20 + $0x50] sm:$0x1]  ;;  %v1378_v1 = vor.u32 %v1377_v53, %v4329_v52  ;;  %v554_v3 = vrot.slane %v552_v55, 5  ;;  %v1386_v28 = vshrl.u32 %v3118_v6, 16  ;;  %v1389_v29 = vshll.u32 %v3118_v6, 16 }
  0x78   : > { %1170 = vmatmul.bf16.gmra.mxu3 %v3512_v8  ;;  %1548 = vmatmul.bf16.gmra.mxu0 %v1468_v9  ;;  %v1354_v8 = vor.u32 %v1353_v59, %v1349_v58  ;;  %v1357_v9 = vshll.u32 %v3114_v60, 16  ;;  %v531_v21 = vsel %vm4060_vm4, %v526_v4, %v530_v2  ;;  %v894_v59 = vpack.c.b16 %v883_v47, %v882_v46  ;;  %v3120_v53 = vld [vmem:[%s3956_s20 + $0x5c] sm:$0x1] }
  0x79   : > { %v630_v38 = vunpack.c.l.b16 %v531_v21  ;;  %v838_v60 = vrot.slane %v4294_v11, 5  ;;  %v1381_v2 = vshll.u32 %v3117_v56, 16  ;;  %v540_v4 = vrot.slane %v539_v54, 4 }
  0x7a   : > { %v1355_v23 = vrot.slane %v1354_v8, 4  ;;  %v1359_v24 = vrot.slane %v1357_v9, 5  ;;  %v550_v5 = vrot.slane %v549_v57, 4  ;;  %v4339_v8 = vld [vmem:[%s3956_s20 + $0x4c] sm:$0xf]  ;;  %v841_v11 = vrot.slane %v402_v41, 5 }
  0x7b   : > { %v641_v58 = vpack.c.b16 %v630_v38, %v629_v37  ;;  %v840_v10 = vrot.slane %v838_v60, 4  ;;  %v1379_v15 = vrot.slane %v1378_v1, 4  ;;  %v1383_v16 = vrot.slane %v1381_v2, 5  ;;  %v3567_v41 = vld [vmem:[%s4831_s1 + $0x208] sm:$0xff] }
  0x7c   : > { %v1360_v40 = vsel %vm4060_vm4, %v1355_v23, %v1359_v24  ;;  %v566_v21 = vshll.u32 %v4339_v8, 16  ;;  %v570_v22 = vshrl.u32 %v4339_v8, 16  ;;  %v3119_v23 = vld [vmem:[%s3956_s20 + $0x58] sm:$0xf]  ;;  %v545_v24 = vsel %vm4060_vm4, %v540_v4, %v4327_v44  ;;  %v405_v44 = vld [vmem:[%s3956_s20 + $0x50] sm:$0x1]  ;;  %2612 = vmatpush.bf16.msra.mxu0 %v3567_v41 }
  0x7d   : > { %v1459_v51 = vunpack.c.l.b16 %v1360_v40  ;;  %v555_v25 = vsel %vm4060_vm4, %v550_v5, %v554_v3  ;;  %v842_v27 = vsel %vm4074_vm5, %v840_v10, %v841_v11  ;;  %v1384_v31 = vsel %vm4060_vm4, %v1379_v15, %v1383_v16  ;;  %v4381_v11 = vld [vmem:[%s3956_s20 + $0x58] sm:$0xf]  ;;  %v3558_v15 = vld [vmem:[%s4831_s1 + $0x1c0] sm:$0xff] }
  0x7e   : > { %v1395_v32 = vshll.u32 %v3119_v23, 16  ;;  %v1399_v33 = vshrl.u32 %v3119_v23, 16  ;;  %v559_v35 = vrot.slane %v557_v18, 4  ;;  %v562_v36 = vrot.slane %v560_v19, 5  ;;  %v3121_v18 = vld [vmem:[%s3956_s20 + $0x60] sm:$0xf]  ;;  %2363 = vmatpush.bf16.msra.mxu3 %v3558_v15 }
  0x7f   : > { %v4368_v37 = vrot.slane %v566_v21, 5  ;;  %v572_v38 = vrot.slane %v570_v22, 4  ;;  %v631_v39 = vunpack.c.l.b16 %v545_v24  ;;  %v632_v40 = vunpack.c.l.b16 %v555_v25  ;;  %v3122_v19 = vld [vmem:[%s3956_s20 + $0x64] sm:$0xf] }
  0x80   : > { %v885_v43 = vunpack.c.l.b16 %v842_v27  ;;  %v1388_v45 = vrot.slane %v1386_v28, 4  ;;  %v1391_v46 = vrot.slane %v1389_v29, 5  ;;  %v576_v55 = vshll.u32 %v405_v44, 16  ;;  %v3534_v27 = vld [vmem:[%s4831_s1 + $0x140] sm:$0xff] }
  0x81   : > { %v845_v56 = vrot.slane %v4339_v8, 5  ;;  %v642_v54 = vpack.c.b16 %v632_v40, %v631_v39  ;;  %v848_v5 = vrot.slane %v405_v44, 5  ;;  %v406_v8 = vld [vmem:[%s3956_s20 + $0x54] sm:$0xf]  ;;  %v590_v23 = vshll.u32 %v4381_v11, 16  ;;  %1787 = vmatpush.bf16.msra.mxu1 %v3534_v27 }
  0x82   : > { %v578_v2 = vrot.slane %v576_v55, 5  ;;  %v581_v21 = vshrl.u32 %v406_v8, 16  ;;  %v584_v22 = vshll.u32 %v406_v8, 16  ;;  %v594_v24 = vshrl.u32 %v4381_v11, 16  ;;  %v3516_v55 = vld [vmem:[%s3956_s20 + $0x54] sm:$0xff] }
  0x83   : > { %v847_v4 = vrot.slane %v845_v56, 4  ;;  %v1410_v28 = vshrl.u32 %v3121_v18, 16  ;;  %v1413_v29 = vshll.u32 %v3121_v18, 16  ;;  %v592_v39 = vrot.slane %v590_v23, 5  ;;  %v4428_v8 = vld [vmem:[%s4832_s2] ss:$0 sm:$0xff] }
  0x84   : > { %v596_v40 = vrot.slane %v594_v24, 4 }
  0x85   : > { %v849_v17 = vsel %vm4074_vm5, %v847_v4, %v848_v5  ;;  %v1412_v44 = vrot.slane %v1410_v28, 4 }
  0x86   : > { %724 = vmatmul.bf16.gmra.mxu1 %v640_v61  ;;  %977 = vmatmul.bf16.gmra.mxu2 %v893_v62  ;;  %v1368_v61 = vor.u32 %v1367_v49, %v1364_v48  ;;  %v3514_v62 = vld [vmem:[%s3956_s20 + $0x3c] sm:$0xff]  ;;  %v1461_v48 = vunpack.c.l.b16 %v1384_v31  ;;  %v1397_v49 = vrot.slane %v1395_v32, 5  ;;  %v1423_v31 = vshrl.u32 %v3122_v19, 16 }
  0x88   : > { %1175 = vmatmul.bf16.gmra.mxu3 %v3513_v63  ;;  %1553 = vmatmul.bf16.gmra.mxu0 %v1469_v0  ;;  %v1470_v63 = vpack.c.b16 %v1459_v51, %v1458_v50  ;;  %v771_v0 = vld [vmem:[%s3956_s20 + $0x3c] sm:$0xe]  ;;  %v1369_v13 = vrot.slane %v1368_v61, 4  ;;  %v1401_v50 = vrot.slane %v1399_v33, 4  ;;  %v563_v51 = vor.u32 %v562_v36, %v559_v35  ;;  %v3566_v36 = vld [vmem:[%s4831_s1 + $0x200] sm:$0xff] }
  0x89   : > { %v2951_v9 = vrot.slane %v771_v0, 9  ;;  %v887_v35 = vunpack.c.l.b16 %v849_v17  ;;  %2613 = vmatpush.bf16.msra.mxu0 %v3566_v36 }
  0x8a   : > { %v1374_v30 = vsel %vm4060_vm4, %v1369_v13, %v4329_v52  ;;  %v573_v52 = vor.u32 %v572_v38, %v4368_v37  ;;  %v564_v0 = vrot.slane %v563_v51, 4  ;;  %v3550_v13 = vld [vmem:[%s4831_s1 + $0x180] sm:$0xff]  ;;  %v586_v38 = vrot.slane %v584_v22, 5 }
  0x8b   : > { %v839_v26 = vsel %vm4074_vm5, %v2951_v9, %v838_v60  ;;  %v1460_v47 = vunpack.c.l.b16 %v1374_v30  ;;  %v3515_v60 = vld [vmem:[%s3956_s20 + $0x48] sm:$0xff]  ;;  %1985 = vmatpush.bf16.msra.mxu2 %v3550_v13  ;;  %v1419_v30 = vshll.u32 %v3122_v19, 16 }
  0x8c   : > { %v884_v42 = vunpack.c.l.b16 %v839_v26  ;;  %v574_v1 = vrot.slane %v573_v52, 4  ;;  %v569_v16 = vsel %vm4060_vm4, %v564_v0, %v4368_v37  ;;  %v583_v37 = vrot.slane %v581_v21, 4 }
  0x8d   : > { %v1471_v61 = vpack.c.b16 %v1461_v48, %v1460_v47  ;;  %v633_v32 = vunpack.c.l.b16 %v569_v16  ;;  %v1425_v47 = vrot.slane %v1423_v31, 4  ;;  %v3123_v48 = vld [vmem:[%s3956_s20 + $0x68] sm:$0x1]  ;;  %v597_v52 = vor.u32 %v596_v40, %v592_v39 }
  0x8e   : > { %v895_v57 = vpack.c.b16 %v885_v43, %v884_v42  ;;  %v579_v14 = vsel %vm4060_vm4, %v574_v1, %v578_v2  ;;  %v408_v43 = vld [vmem:[%s3956_s20 + $0x5c] sm:$0x1]  ;;  %v587_v51 = vor.u32 %v586_v38, %v583_v37  ;;  %v3334_v1 = vld [vmem:[%s3956_s20 + $0x18] sm:$0xf]  ;;  %v3336_v37 = vld [vmem:[%s3956_s20 + $0x20] sm:$0x1] }
  0x8f   : > { %v634_v33 = vunpack.c.l.b16 %v579_v14  ;;  %v598_v0 = vrot.slane %v597_v52, 4  ;;  %v4423_v2 = vld [vmem:[%s3956_s20 + $0x1c] sm:$0xf]  ;;  %v2068_v15 = vshrl.u32 %v3334_v1, 16  ;;  %v2071_v16 = vshll.u32 %v3334_v1, 16 }
  0x90   : > { %v2077_v14 = vshll.u32 %v4423_v2, 16 }
  0x92   : > { %v2079_v31 = vrot.slane %v2077_v14, 5 }
  0x96   : > { %729 = vmatmul.bf16.gmra.mxu1 %v641_v58  ;;  %982 = vmatmul.bf16.gmra.mxu2 %v894_v59  ;;  %v772_v58 = vld [vmem:[%s3956_s20 + $0x48] sm:$0xe]  ;;  %v1392_v59 = vor.u32 %v1391_v46, %v1388_v45  ;;  %v1415_v45 = vrot.slane %v1413_v29, 5  ;;  %v1421_v46 = vrot.slane %v1419_v30, 5  ;;  %v2070_v29 = vrot.slane %v2068_v15, 4 }
  0x97   : > { %v2952_v3 = vrot.slane %v772_v58, 9  ;;  %v2073_v30 = vrot.slane %v2071_v16, 5 }
  0x98   : > { %1180 = vmatmul.bf16.gmra.mxu3 %v3514_v62  ;;  %1558 = vmatmul.bf16.gmra.mxu0 %v1470_v63  ;;  %v1402_v62 = vor.u32 %v1401_v50, %v1397_v49  ;;  %v1405_v63 = vshll.u32 %v3120_v53, 16  ;;  %v1393_v7 = vrot.slane %v1392_v59, 4  ;;  %v773_v59 = vld [vmem:[%s3956_s20 + $0x54] sm:$0xe] }
  0x99   : > { %v846_v6 = vsel %vm4074_vm5, %v2952_v3, %v845_v56  ;;  %v2953_v4 = vrot.slane %v773_v59, 9  ;;  %v3722_v59 = vld [vmem:[%s3956_s20 + $0x14] sm:$0x1] }
  0x9a   : > { %v1403_v9 = vrot.slane %v1402_v62, 4  ;;  %v1407_v10 = vrot.slane %v1405_v63, 5  ;;  %v1398_v25 = vsel %vm4060_vm4, %v1393_v7, %v1397_v49  ;;  %v886_v34 = vunpack.c.l.b16 %v846_v6 }
  0x9b   : > { %v1462_v41 = vunpack.c.l.b16 %v1398_v25  ;;  %v643_v49 = vpack.c.b16 %v634_v33, %v633_v32  ;;  %v1429_v62 = vshll.u32 %v3123_v48, 16  ;;  %v588_v63 = vrot.slane %v587_v51, 4 }
  0x9c   : > { %v1408_v26 = vsel %vm4060_vm4, %v1403_v9, %v1407_v10  ;;  %v896_v50 = vpack.c.b16 %v887_v35, %v886_v34  ;;  %v855_v7 = vrot.slane %v408_v43, 5  ;;  %v2081_v6 = vshrl.u32 %v4423_v2, 16 }
  0x9d   : > { %v1463_v42 = vunpack.c.l.b16 %v1408_v26  ;;  %v593_v19 = vsel %vm4060_vm4, %v588_v63, %v592_v39  ;;  %v2455_v51 = vrot.slane %v4423_v2, 5 }
  0x9e   : > { %v2083_v32 = vrot.slane %v2081_v6, 4  ;;  %v635_v33 = vunpack.c.l.b16 %v593_v19 }
  0x9f   : > { %v1472_v56 = vpack.c.b16 %v1463_v42, %v1462_v41  ;;  %v3172_v41 = vld [vmem:[%s3956_s20 + $0xc] sm:$0xe]  ;;  %v3721_v42 = vld [vmem:[%s3956_s20 + $0x10] sm:$0xf] }
  0xa6   : > { %734 = vmatmul.bf16.gmra.mxu1 %v642_v54  ;;  %987 = vmatmul.bf16.gmra.mxu2 %v895_v57  ;;  %v600_v54 = vshll.u32 %v408_v43, 16  ;;  %v852_v57 = vrot.slane %v4381_v11, 5  ;;  %v1431_v11 = vrot.slane %v1429_v62, 5  ;;  %v1629_v43 = vrot.slane %v3721_v42, 5 }
  0xa7   : > { %v3180_v62 = vrot.slane %v3172_v41, 9  ;;  %v3339_v41 = vld [vmem:[%s3956_s20 + $0x2c] sm:$0x1] }
  0xa8   : > { %1185 = vmatmul.bf16.gmra.mxu3 %v3515_v60  ;;  %1563 = vmatmul.bf16.gmra.mxu0 %v1471_v61  ;;  %v1416_v60 = vor.u32 %v1415_v45, %v1412_v44  ;;  %v1426_v61 = vor.u32 %v1425_v47, %v1421_v46  ;;  %v602_v3 = vrot.slane %v600_v54, 5  ;;  %v854_v5 = vrot.slane %v852_v57, 4 }
  0xa9   : > { %v853_v24 = vsel %vm4074_vm5, %v2953_v4, %v852_v57  ;;  %v2074_v44 = vor.u32 %v2073_v30, %v2070_v29  ;;  %v2084_v45 = vor.u32 %v2083_v32, %v2079_v31  ;;  %v3406_v57 = vld [vmem:[%s3956_s20 + $0x18] sm:$0xe]  ;;  %v1631_v63 = vrot.slane %v1629_v43, 4 }
  0xaa   : > { %v1417_v9 = vrot.slane %v1416_v60, 4  ;;  %v1427_v10 = vrot.slane %v1426_v61, 4  ;;  %v603_v23 = vsel %vm4060_vm4, %v598_v0, %v602_v3  ;;  %v856_v25 = vsel %vm4074_vm5, %v854_v5, %v855_v7  ;;  %v3337_v7 = vld [vmem:[%s3956_s20 + $0x24] sm:$0xf] }
  0xab   : > { %v636_v34 = vunpack.c.l.b16 %v603_v23  ;;  %v888_v35 = vunpack.c.l.b16 %v853_v24  ;;  %v889_v36 = vunpack.c.l.b16 %v856_v25  ;;  %v1632_v60 = vrot.slane %v3722_v59, 5  ;;  %v3173_v59 = vld [vmem:[%s3956_s20 + $0x18] sm:$0xe] }
  0xac   : > { %v1422_v27 = vsel %vm4060_vm4, %v1417_v9, %v1421_v46  ;;  %v1432_v28 = vsel %vm4060_vm4, %v1427_v10, %v1431_v11  ;;  %v2087_v46 = vshll.u32 %v3336_v37, 16  ;;  %v2075_v0 = vrot.slane %v2074_v44, 4  ;;  %v4473_v9 = vld [vmem:[%s3956_s20 + $0x28] sm:$0xf] }
  0xad   : > { %v1464_v38 = vunpack.c.l.b16 %v1422_v27  ;;  %v1465_v39 = vunpack.c.l.b16 %v1432_v28  ;;  %v2085_v1 = vrot.slane %v2084_v45, 4  ;;  %v3414_v2 = vrot.slane %v3406_v57, 9 }
  0xae   : > { %v2089_v3 = vrot.slane %v2087_v46, 5  ;;  %v2457_v4 = vrot.slane %v2455_v51, 4  ;;  %v2458_v5 = vrot.slane %v3336_v37, 5  ;;  %v1630_v11 = vsel %vm4074_vm5, %v3180_v62, %v1629_v43 }
  0xaf   : > { %v1473_v54 = vpack.c.b16 %v1465_v39, %v1464_v38  ;;  %v2080_v15 = vsel %vm4060_vm4, %v2075_v0, %v2079_v31  ;;  %v2092_v23 = vshrl.u32 %v3337_v7, 16  ;;  %v2095_v27 = vshll.u32 %v3337_v7, 16  ;;  %v4518_v7 = vld [vmem:[%s3956_s20 + $0x34] sm:$0xf] }
  0xb0   : > { %v2090_v16 = vsel %vm4060_vm4, %v2085_v1, %v2089_v3  ;;  %v2459_v19 = vsel %vm4074_vm5, %v2457_v4, %v2458_v5  ;;  %v2101_v28 = vshll.u32 %v4473_v9, 16  ;;  %v2105_v29 = vshrl.u32 %v4473_v9, 16  ;;  %v3407_v3 = vld [vmem:[%s3956_s20 + $0x24] sm:$0xe]  ;;  %v3340_v5 = vld [vmem:[%s3956_s20 + $0x30] sm:$0xf] }
  0xb1   : > { %v1700_v31 = vunpack.c.l.b16 %v1630_v11  ;;  %v2094_v37 = vrot.slane %v2092_v23, 4  ;;  %v2097_v38 = vrot.slane %v2095_v27, 5  ;;  %v2111_v62 = vshll.u32 %v3339_v41, 16 }
  0xb2   : > { %v4499_v39 = vrot.slane %v2101_v28, 5  ;;  %v2462_v1 = vrot.slane %v4473_v9, 5  ;;  %v2116_v9 = vshrl.u32 %v3340_v5, 16  ;;  %v2119_v27 = vshll.u32 %v3340_v5, 16 }
  0xb3   : > { %v4414_v53 = vpop.f32.mrf.mxu1  ;;  %v2125_v28 = vshll.u32 %v4518_v7, 16 }
  0xb5   : > { %v4418_v58 = vpop.f32.mrf.mxu0 }
  0xb6   : > { %739 = vmatmul.bf16.gmra.mxu1 %v643_v49  ;;  %992 = vmatmul.bf16.gmra.mxu2 %v896_v50  ;;  %v644_v49 = vpack.c.b16 %v636_v34, %v635_v33  ;;  %v897_v50 = vpack.c.b16 %v889_v36, %v888_v35  ;;  %v2276_v33 = vunpack.c.l.b16 %v2080_v15  ;;  %v2277_v34 = vunpack.c.l.b16 %v2090_v16 }
  0xb7   : > { %v2527_v36 = vunpack.c.l.b16 %v2459_v19  ;;  %v369_v42 = vadd.f32 %v4428_v8, %v4418_v58  ;;  %v2098_v58 = vor.u32 %v2097_v38, %v2094_v37  ;;  %v2113_v16 = vrot.slane %v2111_v62, 5  ;;  %v3725_v62 = vld [vmem:[%s3956_s20 + $0x28] sm:$0xf] }
  0xb8   : > { %1190 = vmatmul.bf16.gmra.mxu3 %v3516_v55  ;;  %1568 = vmatmul.bf16.gmra.mxu0 %v1472_v56  ;;  %v3517_v56 = vld [vmem:[%s3956_s20 + $0x60] sm:$0xff]  ;;  %v2465_v19 = vrot.slane %v3339_v41, 5 }
  0xb9   : > { %v349_v13 = vpop.f32.mrf.mxu2 }
  0xba   : > { %v4433_v17 = vadd.f32 %v4428_v8, %v349_v13  ;;  %v1633_v13 = vsel %vm4074_vm5, %v1631_v63, %v1632_v60 }
  0xbb   : > { %v359_v18 = vpop.f32.mrf.mxu3  ;;  %v4440_v22 = vpop.f32.mrf.mxu1  ;;  %v1701_v32 = vunpack.c.l.b16 %v1633_v13  ;;  %v2099_v13 = vrot.slane %v2098_v58, 4 }
  0xbc   : > { %v4438_v21 = vadd.f32 %v4428_v8, %v359_v18  ;;  %v2456_v18 = vsel %vm4074_vm5, %v3414_v2, %v2455_v51  ;;  %v3723_v51 = vld [vmem:[%s3956_s20 + $0x1c] sm:$0xf]  ;;  %v3181_v2 = vrot.slane %v3173_v59, 9 }
  0xbd   : > { %v4448_v26 = vpop.f32.mrf.mxu0  ;;  %v2526_v35 = vunpack.c.l.b16 %v2456_v18  ;;  %v1716_v44 = vpack.c.b16 %v1701_v32, %v1700_v31  ;;  %v2464_v18 = vrot.slane %v2462_v1, 4  ;;  %v2104_v37 = vsel %vm4060_vm4, %v2099_v13, %v4499_v39 }
  0xbe   : > { %v370_v31 = vadd.f32 %v4428_v8, %v4448_v26 }
  0xc1   : > { %v351_v40 = vpop.f32.mrf.mxu2 }
  0xc2   : > { %v4458_v47 = vadd.f32 %v4428_v8, %v351_v40  ;;  %v2107_v40 = vrot.slane %v2105_v29, 4  ;;  %v2129_v29 = vshrl.u32 %v4518_v7, 16 }
  0xc3   : > { %v361_v48 = vpop.f32.mrf.mxu3  ;;  %v4464_v55 = vpop.f32.mrf.mxu1 }
  0xc4   : > { %v4462_v52 = vadd.f32 %v4428_v8, %v361_v48  ;;  %v3542_v48 = vld [vmem:[%s3956_s20 + $0x18] sm:$0xff]  ;;  %v2108_v60 = vor.u32 %v2107_v40, %v4499_v39 }
  0xc5   : > { %v4469_v61 = vpop.f32.mrf.mxu0 }
  0xc6   : > { %744 = vmatmul.bf16.gmra.mxu1 %v644_v49  ;;  %997 = vmatmul.bf16.gmra.mxu2 %v897_v50  ;;  %v2292_v49 = vpack.c.b16 %v2277_v34, %v2276_v33  ;;  %v2542_v50 = vpack.c.b16 %v2527_v36, %v2526_v35  ;;  %v2109_v15 = vrot.slane %v2108_v60, 4 }
  0xc8   : > { %1195 = vmatmul.bf16.gmra.mxu3 %v3517_v56  ;;  %1573 = vmatmul.bf16.gmra.mxu0 %v1473_v54  ;;  %v1636_v56 = vrot.slane %v3723_v51, 5  ;;  %v2114_v38 = vsel %vm4060_vm4, %v2109_v15, %v2113_v16  ;;  %v3342_v51 = vld [vmem:[%s3956_s20 + $0x38] sm:$0x1]  ;;  %v3543_v15 = vld [vmem:[%s3956_s20 + $0x24] sm:$0xff]  ;;  %v2469_v16 = vrot.slane %v4518_v7, 5 }
  0xc9   : > { %v354_v10 = vpop.f32.mrf.mxu2  ;;  %v2279_v59 = vunpack.c.l.b16 %v2114_v38  ;;  %v2135_v5 = vshll.u32 %v3342_v51, 16 }
  0xca   : > { %v4484_v14 = vadd.f32 %v4428_v8, %v354_v10  ;;  %v1638_v4 = vrot.slane %v1636_v56, 4  ;;  %v3724_v10 = vld [vmem:[%s3956_s20 + $0x20] sm:$0x1]  ;;  %v1637_v35 = vsel %vm4074_vm5, %v3181_v2, %v1636_v56  ;;  %v2471_v7 = vrot.slane %v2469_v16, 4 }
  0xcb   : > { %v364_v6 = vpop.f32.mrf.mxu3  ;;  %v4493_v25 = vpop.f32.mrf.mxu1  ;;  %v1639_v11 = vrot.slane %v3724_v10, 5  ;;  %v1702_v39 = vunpack.c.l.b16 %v1637_v35  ;;  %v371_v10 = vadd.f32 %v4428_v8, %v4469_v61  ;;  %v2137_v35 = vrot.slane %v2135_v5, 5 }
  0xcc   : > { %v4491_v24 = vadd.f32 %v4428_v8, %v364_v6  ;;  %v3415_v6 = vrot.slane %v3407_v3, 9  ;;  %v3174_v3 = vld [vmem:[%s3956_s20 + $0x24] sm:$0xe] }
  0xcd   : > { %v4497_v30 = vpop.f32.mrf.mxu0  ;;  %v1640_v36 = vsel %vm4074_vm5, %v1638_v4, %v1639_v11 }
  0xd1   : > { %v356_v43 = vpop.f32.mrf.mxu2 }
  0xd2   : > { %v4505_v45 = vadd.f32 %v4428_v8, %v356_v43  ;;  %v2466_v43 = vsel %vm4074_vm5, %v2464_v18, %v2465_v19 }
  0xd3   : > { %v366_v46 = vpop.f32.mrf.mxu3  ;;  %v710_v57 = vpop.f32.mrf.mxu1  ;;  %v2529_v60 = vunpack.c.l.b16 %v2466_v43 }
  0xd4   : > { %v4510_v54 = vadd.f32 %v4428_v8, %v366_v46  ;;  %v750_v63 = vadd.f32 %v710_v57, %v369_v42  ;;  %v2463_v42 = vsel %vm4074_vm5, %v3415_v6, %v2462_v1  ;;  %v2121_v46 = vrot.slane %v2119_v27, 5 }
  0xd5   : > { %v1539_v0 = vpop.f32.mrf.mxu0  ;;  %v2278_v57 = vunpack.c.l.b16 %v2104_v37  ;;  %v2528_v58 = vunpack.c.l.b16 %v2463_v42  ;;  %v2472_v37 = vrot.slane %v3342_v51, 5  ;;  %v372_v42 = vadd.f32 %v4428_v8, %v4497_v30 }
  0xd6   : > { %1788 = vmatmul.bf16.vlgmr.msra.gmra.mxu1 %v1716_v44  ;;  %1986 = vmatmul.bf16.vlgmr.msra.gmra.mxu2 %v3542_v48  ;;  %v2118_v44 = vrot.slane %v2116_v9, 4  ;;  %v4538_v48 = vrot.slane %v2125_v28, 5 }
  0xd7   : > { %v2293_v18 = vpack.c.b16 %v2279_v59, %v2278_v57  ;;  %v2543_v19 = vpack.c.b16 %v2529_v60, %v2528_v58  ;;  %v2473_v30 = vsel %vm4074_vm5, %v2471_v7, %v2472_v37 }
  0xd8   : > { %2364 = vmatmul.bf16.vlgmr.msra.gmra.mxu3 %v2292_v49  ;;  %2614 = vmatmul.bf16.vlgmr.msra.gmra.mxu0 %v2542_v50  ;;  %v2131_v49 = vrot.slane %v2129_v29, 4  ;;  %v1703_v50 = vunpack.c.l.b16 %v1640_v36  ;;  %v2122_v2 = vor.u32 %v2121_v46, %v2118_v44  ;;  %v3182_v29 = vrot.slane %v3174_v3, 9 }
  0xd9   : > { %v963_v23 = vpop.f32.mrf.mxu2 }
  0xda   : > { %v1003_v32 = vadd.f32 %v963_v23, %v750_v63  ;;  %v1643_v63 = vrot.slane %v3725_v62, 5  ;;  %v2132_v4 = vor.u32 %v2131_v49, %v4538_v48  ;;  %v1717_v13 = vpack.c.b16 %v1703_v50, %v1702_v39  ;;  %v3408_v23 = vld [vmem:[%s3956_s20 + $0x30] sm:$0xe] }
  0xdb   : > { %v1161_v33 = vpop.f32.mrf.mxu3  ;;  %v712_v34 = vpop.f32.mrf.mxu1  ;;  %v2123_v61 = vrot.slane %v2122_v2, 4  ;;  %v3416_v36 = vrot.slane %v3408_v23, 9 }
  0xdc   : > { %v1201_v40 = vadd.f32 %v1161_v33, %v1003_v32  ;;  %v751_v41 = vadd.f32 %v712_v34, %v370_v31  ;;  %v1645_v31 = vrot.slane %v1643_v63, 4  ;;  %v3726_v32 = vld [vmem:[%s3956_s20 + $0x2c] sm:$0x1]  ;;  %v2133_v34 = vrot.slane %v2132_v4, 4 }
  0xdd   : > { %v1541_v26 = vpop.f32.mrf.mxu0  ;;  %v1646_v33 = vrot.slane %v3726_v32, 5  ;;  %v1644_v44 = vsel %vm4074_vm5, %v3182_v29, %v1643_v63  ;;  %v2470_v51 = vsel %vm4074_vm5, %v3416_v36, %v2469_v16 }
  0xde   : > { %v4541_v56 = vadd.f32 %v1539_v0, %v1201_v40  ;;  %v3343_v40 = vld [vmem:[%s3956_s20 + $0x3c] sm:$0xf]  ;;  %v2138_v50 = vsel %vm4060_vm4, %v2133_v34, %v2137_v35  ;;  %v1704_v3 = vunpack.c.l.b16 %v1644_v44  ;;  %v3175_v35 = vld [vmem:[%s3956_s20 + $0x30] sm:$0xe] }
  0xdf   : > { %v1647_v46 = vsel %vm4074_vm5, %v1645_v31, %v1646_v33  ;;  %v2140_v59 = vshrl.u32 %v3343_v40, 16  ;;  %v2143_v58 = vshll.u32 %v3343_v40, 16  ;;  %v2281_v5 = vunpack.c.l.b16 %v2138_v50  ;;  %v3544_v31 = vld [vmem:[%s3956_s20 + $0x30] sm:$0xff]  ;;  %v3409_v44 = vld [vmem:[%s3956_s20 + $0x3c] sm:$0xe] }
  0xe0   : > { %v1705_v2 = vunpack.c.l.b16 %v1647_v46  ;;  %v3727_v33 = vld [vmem:[%s3956_s20 + $0x34] sm:$0xf]  ;;  %v3183_v46 = vrot.slane %v3175_v35, 9 }
  0xe1   : > { %v965_v1 = vpop.f32.mrf.mxu2 }
  0xe2   : > { %v1004_v0 = vadd.f32 %v965_v1, %v751_v41  ;;  %v4556_v41 = vld [vmem:[%s3956_s20 + $0x40] sm:$0xf]  ;;  %v1718_v29 = vpack.c.b16 %v1705_v2, %v1704_v3 }
  0xe3   : > { %v1163_v11 = vpop.f32.mrf.mxu3  ;;  %v715_v6 = vpop.f32.mrf.mxu1  ;;  %v2149_v60 = vshll.u32 %v4556_v41, 16  ;;  %v2153_v62 = vshrl.u32 %v4556_v41, 16 }
  0xe4   : > { %v1202_v9 = vadd.f32 %v1163_v11, %v1004_v0  ;;  %v752_v27 = vadd.f32 %v715_v6, %v371_v10  ;;  %v2530_v10 = vunpack.c.l.b16 %v2470_v51  ;;  %v2531_v0 = vunpack.c.l.b16 %v2473_v30  ;;  %v3728_v51 = vld [vmem:[%s3956_s20 + $0x38] sm:$0x1] }
  0xe5   : > { %v1544_v28 = vpop.f32.mrf.mxu0  ;;  %v4577_v16 = vrot.slane %v2149_v60, 5  ;;  %v2155_v6 = vrot.slane %v2153_v62, 4  ;;  %v1653_v30 = vrot.slane %v3728_v51, 5  ;;  %v3417_v60 = vrot.slane %v3409_v44, 9  ;;  %v3176_v44 = vld [vmem:[%s3956_s20 + $0x3c] sm:$0xe] }
  0xe6   : > { %1793 = vmatmul.bf16.gmra.mxu1 %v1717_v13  ;;  %1991 = vmatmul.bf16.gmra.mxu2 %v3543_v15  ;;  %v4552_v38 = vadd.f32 %v1541_v26, %v1202_v9  ;;  %v2128_v26 = vsel %vm4060_vm4, %v2123_v61, %v4538_v48  ;;  %v2142_v13 = vrot.slane %v2140_v59, 4  ;;  %v2145_v15 = vrot.slane %v2143_v58, 5 }
  0xe7   : > { %v2280_v4 = vunpack.c.l.b16 %v2128_v26  ;;  %v2544_v34 = vpack.c.b16 %v2531_v0, %v2530_v10  ;;  %v2156_v7 = vor.u32 %v2155_v6, %v4577_v16  ;;  %v375_v51 = vadd.f32 %v4428_v8, %v4464_v55 }
  0xe8   : > { %2369 = vmatmul.bf16.gmra.mxu3 %v2293_v18  ;;  %2619 = vmatmul.bf16.gmra.mxu0 %v2543_v19  ;;  %v3345_v18 = vld [vmem:[%s3956_s20 + $0x44] sm:$0x1]  ;;  %v373_v19 = vadd.f32 %v4428_v8, %v4414_v53  ;;  %v2146_v36 = vor.u32 %v2145_v15, %v2142_v13 }
  0xe9   : > { %v968_v43 = vpop.f32.mrf.mxu2  ;;  %v2294_v32 = vpack.c.b16 %v2281_v5, %v2280_v4  ;;  %v2159_v37 = vshll.u32 %v3345_v18, 16  ;;  %v2157_v59 = vrot.slane %v2156_v7, 4 }
  0xea   : > { %v1005_v49 = vadd.f32 %v968_v43, %v752_v27  ;;  %v2476_v43 = vrot.slane %v4556_v41, 5  ;;  %v2479_v41 = vrot.slane %v3345_v18, 5 }
  0xeb   : > { %v1166_v39 = vpop.f32.mrf.mxu3  ;;  %v717_v57 = vpop.f32.mrf.mxu1  ;;  %v2161_v58 = vrot.slane %v2159_v37, 5 }
  0xec   : > { %v1203_v48 = vadd.f32 %v1166_v39, %v1005_v49  ;;  %v753_v63 = vadd.f32 %v717_v57, %v372_v42  ;;  %v3346_v49 = vld [vmem:[%s3956_s20 + $0x48] sm:$0xf]  ;;  %v4590_v39 = vld [vmem:[%s3956_s20 + $0x4c] sm:$0xf]  ;;  %v2147_v57 = vrot.slane %v2146_v36, 4  ;;  %v2478_v62 = vrot.slane %v2476_v43, 4 }
  0xed   : > { %v1546_v1 = vpop.f32.mrf.mxu0  ;;  %v2167_v3 = vshll.u32 %v3346_v49, 16  ;;  %v2173_v2 = vshll.u32 %v4590_v39, 16  ;;  %v2177_v4 = vshrl.u32 %v4590_v39, 16  ;;  %v2162_v18 = vsel %vm4060_vm4, %v2157_v59, %v2161_v58  ;;  %v3545_v59 = vld [vmem:[%s3956_s20 + $0x3c] sm:$0xff] }
  0xee   : > { %v4575_v11 = vadd.f32 %v1544_v28, %v1203_v48  ;;  %v1650_v28 = vrot.slane %v3727_v33, 5  ;;  %v2152_v6 = vsel %vm4060_vm4, %v2147_v57, %v4577_v16  ;;  %v2283_v36 = vunpack.c.l.b16 %v2162_v18 }
  0xef   : > { %v2179_v33 = vrot.slane %v2177_v4, 4  ;;  %v2282_v35 = vunpack.c.l.b16 %v2152_v6  ;;  %v2483_v58 = vrot.slane %v4590_v39, 5  ;;  %v3184_v4 = vrot.slane %v3176_v44, 9 }
  0xf0   : > { %v1652_v26 = vrot.slane %v1650_v28, 4  ;;  %v1651_v13 = vsel %vm4074_vm5, %v3183_v46, %v1650_v28 }
  0xf1   : > { %v970_v23 = vpop.f32.mrf.mxu2  ;;  %v1706_v16 = vunpack.c.l.b16 %v1651_v13  ;;  %v2485_v39 = vrot.slane %v2483_v58, 4 }
  0xf2   : > { %v1006_v9 = vadd.f32 %v970_v23, %v753_v63  ;;  %v2164_v63 = vshrl.u32 %v3346_v49, 16  ;;  %v1654_v15 = vsel %vm4074_vm5, %v1652_v26, %v1653_v30 }
  0xf3   : > { %v1168_v27 = vpop.f32.mrf.mxu3  ;;  %v720_v61 = vpop.f32.mrf.mxu1  ;;  %v1707_v28 = vunpack.c.l.b16 %v1654_v15 }
  0xf4   : > { %v1204_v53 = vadd.f32 %v1168_v27, %v1006_v9  ;;  %v754_v40 = vadd.f32 %v720_v61, %v373_v19  ;;  %v2477_v9 = vsel %vm4074_vm5, %v3417_v60, %v2476_v43  ;;  %v2480_v27 = vsel %vm4074_vm5, %v2478_v62, %v2479_v41  ;;  %v3348_v61 = vld [vmem:[%s3956_s20 + $0x50] sm:$0x1] }
  0xf5   : > { %v1549_v42 = vpop.f32.mrf.mxu0  ;;  %v2532_v7 = vunpack.c.l.b16 %v2477_v9  ;;  %v2533_v37 = vunpack.c.l.b16 %v2480_v27  ;;  %v2183_v49 = vshll.u32 %v3348_v61, 16  ;;  %v1719_v57 = vpack.c.b16 %v1707_v28, %v1706_v16 }
  0xf6   : > { %1798 = vmatmul.bf16.gmra.mxu1 %v1718_v29  ;;  %1996 = vmatmul.bf16.gmra.mxu2 %v3544_v31  ;;  %v4592_v50 = vadd.f32 %v1546_v1, %v1204_v53  ;;  %v374_v1 = vadd.f32 %v4428_v8, %v4440_v22  ;;  %v2166_v29 = vrot.slane %v2164_v63, 4  ;;  %v2169_v31 = vrot.slane %v2167_v3, 5  ;;  %v3729_v53 = vld [vmem:[%s3956_s20 + $0x40] sm:$0xf] }
  0xf7   : > { %v2295_v62 = vpack.c.b16 %v2283_v36, %v2282_v35  ;;  %v2545_v41 = vpack.c.b16 %v2533_v37, %v2532_v7  ;;  %v2185_v13 = vrot.slane %v2183_v49, 5  ;;  %v2486_v6 = vrot.slane %v3348_v61, 5 }
  0xf8   : > { %2374 = vmatmul.bf16.gmra.mxu3 %v2294_v32  ;;  %2624 = vmatmul.bf16.gmra.mxu0 %v2544_v34  ;;  %v4612_v32 = vrot.slane %v2173_v2, 5  ;;  %v2170_v46 = vor.u32 %v2169_v31, %v2166_v29  ;;  %v376_v9 = vadd.f32 %v4428_v8, %v4493_v25 }
  0xf9   : > { %v973_v48 = vpop.f32.mrf.mxu2  ;;  %v2487_v8 = vsel %vm4074_vm5, %v2485_v39, %v2486_v6 }
  0xfa   : > { %v1007_v5 = vadd.f32 %v973_v48, %v754_v40  ;;  %v1657_v40 = vrot.slane %v3729_v53, 5  ;;  %v2180_v26 = vor.u32 %v2179_v33, %v4612_v32  ;;  %v3410_v48 = vld [vmem:[%s3956_s20 + $0x48] sm:$0xe]  ;;  %v2171_v55 = vrot.slane %v2170_v46, 4 }
  0xfb   : > { %v1171_v10 = vpop.f32.mrf.mxu3  ;;  %v722_v0 = vpop.f32.mrf.mxu1  ;;  %v3418_v15 = vrot.slane %v3410_v48, 9 }
  0xfc   : > { %v1205_v19 = vadd.f32 %v1171_v10, %v1007_v5  ;;  %v755_v23 = vadd.f32 %v722_v0, %v374_v1  ;;  %v1659_v1 = vrot.slane %v1657_v40, 4  ;;  %v3730_v5 = vld [vmem:[%s3956_s20 + $0x44] sm:$0x1]  ;;  %v2181_v0 = vrot.slane %v2180_v26, 4 }
  0xfd   : > { %v1551_v22 = vpop.f32.mrf.mxu0  ;;  %v1660_v10 = vrot.slane %v3730_v5, 5  ;;  %v1658_v29 = vsel %vm4074_vm5, %v3184_v4, %v1657_v40  ;;  %v2484_v61 = vsel %vm4074_vm5, %v3418_v15, %v2483_v58 }
  0xfe   : > { %v4615_v34 = vadd.f32 %v1549_v42, %v1205_v19  ;;  %v3349_v19 = vld [vmem:[%s3956_s20 + $0x54] sm:$0xf]  ;;  %v2186_v28 = vsel %vm4060_vm4, %v2181_v0, %v2185_v13  ;;  %v2534_v49 = vunpack.c.l.b16 %v2484_v61 }
  0xff   : > { %v1661_v31 = vsel %vm4074_vm5, %v1659_v1, %v1660_v10  ;;  %v2188_v35 = vshrl.u32 %v3349_v19, 16  ;;  %v2191_v36 = vshll.u32 %v3349_v19, 16  ;;  %v2285_v26 = vunpack.c.l.b16 %v2186_v28  ;;  %v3731_v1 = vld [vmem:[%s3956_s20 + $0x4c] sm:$0xf]  ;;  %v3732_v28 = vld [vmem:[%s3956_s20 + $0x50] sm:$0x1] }
 0x100   : > { %v1709_v44 = vunpack.c.l.b16 %v1661_v31  ;;  %v1664_v5 = vrot.slane %v3731_v1, 5  ;;  %v1667_v61 = vrot.slane %v3732_v28, 5 }
 0x101   : > { %v975_v43 = vpop.f32.mrf.mxu2 }
 0x102   : > { %v1008_v42 = vadd.f32 %v975_v43, %v755_v23  ;;  %v4630_v23 = vld [vmem:[%s3956_s20 + $0x58] sm:$0xf]  ;;  %v1708_v43 = vunpack.c.l.b16 %v1658_v29  ;;  %v1666_v31 = vrot.slane %v1664_v5, 4 }
 0x103   : > { %v1173_v30 = vpop.f32.mrf.mxu3  ;;  %v725_v60 = vpop.f32.mrf.mxu1  ;;  %v2197_v7 = vshll.u32 %v4630_v23, 16  ;;  %v2201_v37 = vshrl.u32 %v4630_v23, 16 }
 0x104   : > { %v1206_v63 = vadd.f32 %v1173_v30, %v1008_v42  ;;  %v756_v3 = vadd.f32 %v725_v60, %v375_v51  ;;  %v2535_v51 = vunpack.c.l.b16 %v2487_v8  ;;  %v2190_v30 = vrot.slane %v2188_v35, 4  ;;  %v3351_v60 = vld [vmem:[%s3956_s20 + $0x5c] sm:$0x1] }
 0x105   : > { %v1554_v2 = vpop.f32.mrf.mxu0  ;;  %v2203_v58 = vrot.slane %v2201_v37, 4  ;;  %v2207_v15 = vshll.u32 %v3351_v60, 16 }
 0x106   : > { %1803 = vmatmul.bf16.gmra.mxu1 %v1719_v57  ;;  %2001 = vmatmul.bf16.gmra.mxu2 %v3545_v59  ;;  %v4626_v18 = vadd.f32 %v1551_v22, %v1206_v63  ;;  %v2176_v22 = vsel %vm4060_vm4, %v2171_v55, %v4612_v32  ;;  %v2193_v57 = vrot.slane %v2191_v36, 5  ;;  %v4651_v59 = vrot.slane %v2197_v7, 5  ;;  %v3177_v55 = vld [vmem:[%s3956_s20 + $0x48] sm:$0xe] }
 0x107   : > { %v2284_v46 = vunpack.c.l.b16 %v2176_v22  ;;  %v1720_v63 = vpack.c.b16 %v1709_v44, %v1708_v43  ;;  %v3185_v29 = vrot.slane %v3177_v55, 9  ;;  %v3352_v22 = vld [vmem:[%s3956_s20 + $0x60] sm:$0xf] }
 0x108   : > { %2379 = vmatmul.bf16.gmra.mxu3 %v2295_v62  ;;  %2629 = vmatmul.bf16.gmra.mxu0 %v2545_v41  ;;  %v2194_v0 = vor.u32 %v2193_v57, %v2190_v30  ;;  %v2204_v13 = vor.u32 %v2203_v58, %v4651_v59  ;;  %v2212_v37 = vshrl.u32 %v3352_v22, 16 }
 0x109   : > { %v978_v27 = vpop.f32.mrf.mxu2  ;;  %v2296_v4 = vpack.c.b16 %v2285_v26, %v2284_v46  ;;  %v1665_v26 = vsel %vm4074_vm5, %v3185_v29, %v1664_v5  ;;  %v3354_v5 = vld [vmem:[%s3956_s20 + $0x68] sm:$0x1] }
 0x10a   : > { %v1009_v33 = vadd.f32 %v978_v27, %v756_v3  ;;  %v3546_v3 = vld [vmem:[%s3956_s20 + $0x48] sm:$0xff]  ;;  %v3411_v27 = vld [vmem:[%s3956_s20 + $0x54] sm:$0xe]  ;;  %v2195_v8 = vrot.slane %v2194_v0, 4  ;;  %v2231_v29 = vshll.u32 %v3354_v5, 16 }
 0x10b   : > { %v1176_v16 = vpop.f32.mrf.mxu3  ;;  %v727_v25 = vpop.f32.mrf.mxu1  ;;  %v3419_v35 = vrot.slane %v3411_v27, 9 }
 0x10c   : > { %v1207_v32 = vadd.f32 %v1176_v16, %v1009_v33  ;;  %v757_v53 = vadd.f32 %v727_v25, %v376_v9  ;;  %v2490_v9 = vrot.slane %v4630_v23, 5  ;;  %v4663_v33 = vld [vmem:[%s3956_s20 + $0x64] sm:$0xf]  ;;  %v2205_v25 = vrot.slane %v2204_v13, 4  ;;  %v3733_v13 = vld [vmem:[%s3956_s20 + $0x58] sm:$0xf] }
 0x10d   : > { %v1556_v40 = vpop.f32.mrf.mxu0  ;;  %v2493_v23 = vrot.slane %v3351_v60, 5  ;;  %v2225_v43 = vshrl.u32 %v4663_v33, 16 }
 0x10e   : > { %v4649_v42 = vadd.f32 %v1554_v2, %v1207_v32  ;;  %v2546_v2 = vpack.c.b16 %v2535_v51, %v2534_v49  ;;  %v2492_v36 = vrot.slane %v2490_v9, 4  ;;  %v2215_v32 = vshll.u32 %v3352_v22, 16 }
 0x10f   : > { %v1668_v49 = vsel %vm4074_vm5, %v1666_v31, %v1667_v61  ;;  %v2200_v51 = vsel %vm4060_vm4, %v2195_v8, %v4651_v59  ;;  %v2227_v59 = vrot.slane %v2225_v43, 4  ;;  %v3547_v61 = vld [vmem:[%s3956_s20 + $0x54] sm:$0xff] }
 0x110   : > { %v1711_v1 = vunpack.c.l.b16 %v1668_v49  ;;  %v2500_v49 = vrot.slane %v3354_v5, 5 }
 0x111   : > { %v980_v62 = vpop.f32.mrf.mxu2 }
 0x112   : > { %v1010_v41 = vadd.f32 %v980_v62, %v757_v53  ;;  %v2221_v53 = vshll.u32 %v4663_v33, 16  ;;  %v2491_v62 = vsel %vm4074_vm5, %v3419_v35, %v2490_v9  ;;  %v3412_v35 = vld [vmem:[%s3956_s20 + $0x60] sm:$0xe] }
 0x113   : > { %v1178_v48 = vpop.f32.mrf.mxu3  ;;  %v730_v10 = vpop.f32.mrf.mxu1  ;;  %v2536_v55 = vunpack.c.l.b16 %v2491_v62 }
 0x114   : > { %v1208_v39 = vadd.f32 %v1178_v48, %v1010_v41  ;;  %v758_v6 = vadd.f32 %v730_v10, %v4433_v17  ;;  %v2209_v17 = vrot.slane %v2207_v15, 5  ;;  %v2494_v41 = vsel %vm4074_vm5, %v2492_v36, %v2493_v23 }
 0x115   : > { %v1559_v19 = vpop.f32.mrf.mxu0  ;;  %v2214_v48 = vrot.slane %v2212_v37, 4  ;;  %v2537_v0 = vunpack.c.l.b16 %v2494_v41  ;;  %v1671_v15 = vrot.slane %v3733_v13, 5 }
 0x116   : > { %1808 = vmatmul.bf16.gmra.mxu1 %v1720_v63  ;;  %2006 = vmatmul.bf16.gmra.mxu2 %v3546_v3  ;;  %v4665_v16 = vadd.f32 %v1556_v40, %v1208_v39  ;;  %v2210_v30 = vsel %vm4060_vm4, %v2205_v25, %v2209_v17  ;;  %v2217_v63 = vrot.slane %v2215_v32, 5  ;;  %v4684_v3 = vrot.slane %v2221_v53, 5  ;;  %v3734_v53 = vld [vmem:[%s3956_s20 + $0x5c] sm:$0x1] }
 0x117   : > { %v2547_v17 = vpack.c.b16 %v2537_v0, %v2536_v55  ;;  %v1673_v32 = vrot.slane %v1671_v15, 4  ;;  %v1674_v43 = vrot.slane %v3734_v53, 5 }
 0x118   : > { %2384 = vmatmul.bf16.gmra.mxu3 %v2296_v4  ;;  %2634 = vmatmul.bf16.gmra.mxu0 %v2546_v2  ;;  %v1710_v4 = vunpack.c.l.b16 %v1665_v26  ;;  %v2287_v2 = vunpack.c.l.b16 %v2210_v30  ;;  %v2218_v9 = vor.u32 %v2217_v63, %v2214_v48  ;;  %v2228_v27 = vor.u32 %v2227_v59, %v4684_v3  ;;  %v4701_v30 = vld [vmem:[%s3956_s20 + $0x70] sm:$0xf] }
 0x119   : > { %v983_v7 = vpop.f32.mrf.mxu2  ;;  %v1675_v62 = vsel %vm4074_vm5, %v1673_v32, %v1674_v43  ;;  %v2249_v55 = vshrl.u32 %v4701_v30, 16 }
 0x11a   : > { %v1011_v44 = vadd.f32 %v983_v7, %v758_v6  ;;  %v3178_v6 = vld [vmem:[%s3956_s20 + $0x54] sm:$0xe]  ;;  %v1721_v28 = vpack.c.b16 %v1711_v1, %v1710_v4 }
 0x11b   : > { %v1181_v40 = vpop.f32.mrf.mxu3  ;;  %v732_v46 = vpop.f32.mrf.mxu1  ;;  %v3186_v37 = vrot.slane %v3178_v6, 9 }
 0x11c   : > { %v1209_v57 = vadd.f32 %v1181_v40, %v1011_v44  ;;  %v759_v58 = vadd.f32 %v732_v46, %v4458_v47  ;;  %v2286_v47 = vunpack.c.l.b16 %v2200_v51  ;;  %v2219_v44 = vrot.slane %v2218_v9, 4 }
 0x11d   : > { %v1561_v60 = vpop.f32.mrf.mxu0  ;;  %v2229_v40 = vrot.slane %v2228_v27, 4  ;;  %v2233_v46 = vrot.slane %v2231_v29, 5 }
 0x11e   : > { %v4687_v10 = vadd.f32 %v1559_v19, %v1209_v57  ;;  %v2497_v19 = vrot.slane %v4663_v33, 5  ;;  %v2297_v25 = vpack.c.b16 %v2287_v2, %v2286_v47  ;;  %v3420_v33 = vrot.slane %v3412_v35, 9 }
 0x11f   : > { %v2224_v41 = vsel %vm4060_vm4, %v2219_v44, %v4684_v3  ;;  %v2245_v2 = vshll.u32 %v4701_v30, 16  ;;  %v3179_v44 = vld [vmem:[%s3956_s20 + $0x60] sm:$0xe] }
 0x120   : > { %v2499_v26 = vrot.slane %v2497_v19, 4  ;;  %v2498_v59 = vsel %vm4074_vm5, %v3420_v33, %v2497_v19  ;;  %v2288_v6 = vunpack.c.l.b16 %v2224_v41  ;;  %v2251_v19 = vrot.slane %v2249_v55, 4 }
 0x121   : > { %v985_v39 = vpop.f32.mrf.mxu2  ;;  %v2538_v27 = vunpack.c.l.b16 %v2498_v59 }
 0x122   : > { %v1012_v31 = vadd.f32 %v985_v39, %v759_v58  ;;  %v1672_v58 = vsel %vm4074_vm5, %v3186_v37, %v1671_v15  ;;  %v2501_v4 = vsel %vm4074_vm5, %v2499_v26, %v2500_v49  ;;  %v1713_v39 = vunpack.c.l.b16 %v1675_v62  ;;  %v3735_v37 = vld [vmem:[%s3956_s20 + $0x64] sm:$0xf] }
 0x123   : > { %v1183_v22 = vpop.f32.mrf.mxu3  ;;  %v735_v8 = vpop.f32.mrf.mxu1  ;;  %v1712_v15 = vunpack.c.l.b16 %v1672_v58  ;;  %v2539_v29 = vunpack.c.l.b16 %v2501_v4  ;;  %v1678_v32 = vrot.slane %v3735_v37, 5  ;;  %v3187_v58 = vrot.slane %v3179_v44, 9 }
 0x124   : > { %v1210_v36 = vadd.f32 %v1183_v22, %v1012_v31  ;;  %v760_v23 = vadd.f32 %v735_v8, %v4484_v14  ;;  %v3355_v14 = vld [vmem:[%s3956_s20 + $0x6c] sm:$0xf]  ;;  %v3357_v8 = vld [vmem:[%s3956_s20 + $0x74] sm:$0x1] }
 0x125   : > { %v1564_v7 = vpop.f32.mrf.mxu0  ;;  %v2236_v5 = vshrl.u32 %v3355_v14, 16  ;;  %v2239_v47 = vshll.u32 %v3355_v14, 16  ;;  %v1722_v35 = vpack.c.b16 %v1713_v39, %v1712_v15  ;;  %v2548_v43 = vpack.c.b16 %v2539_v29, %v2538_v27 }
 0x126   : > { %1813 = vmatmul.bf16.gmra.mxu1 %v1721_v28  ;;  %2011 = vmatmul.bf16.gmra.mxu2 %v3547_v61  ;;  %v4697_v51 = vadd.f32 %v1561_v60, %v1210_v36  ;;  %v2234_v60 = vsel %vm4060_vm4, %v2229_v40, %v2233_v46  ;;  %v2247_v61 = vrot.slane %v2245_v2, 5  ;;  %v3548_v36 = vld [vmem:[%s3956_s20 + $0x60] sm:$0xff]  ;;  %v2255_v46 = vshll.u32 %v3357_v8, 16 }
 0x127   : > { %v2289_v9 = vunpack.c.l.b16 %v2234_v60  ;;  %v2238_v22 = vrot.slane %v2236_v5, 4  ;;  %v2241_v28 = vrot.slane %v2239_v47, 5  ;;  %v2504_v14 = vrot.slane %v4701_v30, 5 }
 0x128   : > { %2389 = vmatmul.bf16.gmra.mxu3 %v2297_v25  ;;  %2639 = vmatmul.bf16.gmra.mxu0 %v2547_v17  ;;  %v2252_v40 = vor.u32 %v2251_v19, %v2247_v61  ;;  %v1680_v62 = vrot.slane %v1678_v32, 4  ;;  %v2257_v4 = vrot.slane %v2255_v46, 5 }
 0x129   : > { %v988_v57 = vpop.f32.mrf.mxu2  ;;  %v2506_v5 = vrot.slane %v2504_v14, 4 }
 0x12a   : > { %v1013_v48 = vadd.f32 %v988_v57, %v760_v23  ;;  %v2298_v23 = vpack.c.b16 %v2289_v9, %v2288_v6  ;;  %v3413_v57 = vld [vmem:[%s3956_s20 + $0x6c] sm:$0xe]  ;;  %v2253_v59 = vrot.slane %v2252_v40, 4 }
 0x12b   : > { %v1186_v63 = vpop.f32.mrf.mxu3  ;;  %v737_v1 = vpop.f32.mrf.mxu1 }
 0x12c   : > { %v1211_v3 = vadd.f32 %v1186_v63, %v1013_v48  ;;  %v761_v0 = vadd.f32 %v737_v1, %v4505_v45  ;;  %v3736_v48 = vld [vmem:[%s3956_s20 + $0x68] sm:$0x1]  ;;  %v3421_v1 = vrot.slane %v3413_v57, 9  ;;  %v2258_v15 = vsel %vm4060_vm4, %v2253_v59, %v2257_v4 }
 0x12d   : > { %v1566_v13 = vpop.f32.mrf.mxu0  ;;  %v1681_v63 = vrot.slane %v3736_v48, 5 }
 0x12e   : > { %v4719_v31 = vadd.f32 %v1564_v7, %v1211_v3  ;;  %v2242_v7 = vor.u32 %v2241_v28, %v2238_v22  ;;  %v1679_v3 = vsel %vm4074_vm5, %v3187_v58, %v1678_v32  ;;  %v2505_v27 = vsel %vm4074_vm5, %v3421_v1, %v2504_v14 }
 0x12f   : > { %v1714_v22 = vunpack.c.l.b16 %v1679_v3 }
 0x130   : > { %v2243_v60 = vrot.slane %v2242_v7, 4 }
 0x131   : > { %v990_v25 = vpop.f32.mrf.mxu2 }
 0x132   : > { %v1014_v17 = vadd.f32 %v990_v25, %v761_v0  ;;  %v1682_v0 = vsel %vm4074_vm5, %v1680_v62, %v1681_v63  ;;  %v2540_v25 = vunpack.c.l.b16 %v2505_v27 }
 0x133   : > { %v1188_v45 = vpop.f32.mrf.mxu3  ;;  %v740_v53 = vpop.f32.mrf.mxu1  ;;  %v1715_v28 = vunpack.c.l.b16 %v1682_v0 }
 0x134   : > { %v1212_v33 = vadd.f32 %v1188_v45, %v1014_v17  ;;  %v762_v26 = vadd.f32 %v740_v53, %v4438_v21  ;;  %v2507_v21 = vrot.slane %v3357_v8, 5 }
 0x135   : > { %v1569_v49 = vpop.f32.mrf.mxu0 }
 0x136   : > { %1818 = vmatmul.bf16.gmra.mxu1 %v1722_v35  ;;  %2016 = vmatmul.bf16.gmra.mxu2 %v3548_v36  ;;  %v4728_v41 = vadd.f32 %v1566_v13, %v1212_v33  ;;  %v2248_v13 = vsel %vm4060_vm4, %v2243_v60, %v2247_v61  ;;  %v2508_v29 = vsel %vm4074_vm5, %v2506_v5, %v2507_v21  ;;  %v2291_v61 = vunpack.c.l.b16 %v2258_v15 }
 0x137   : > { %v2290_v8 = vunpack.c.l.b16 %v2248_v13  ;;  %v2541_v12 = vunpack.c.l.b16 %v2508_v29  ;;  %v1723_v36 = vpack.c.b16 %v1715_v28, %v1714_v22 }
 0x138   : > { %2394 = vmatmul.bf16.gmra.mxu3 %v2298_v23  ;;  %2644 = vmatmul.bf16.gmra.mxu0 %v2548_v43 }
 0x139   : > { %v993_v47 = vpop.f32.mrf.mxu2  ;;  %v2299_v37 = vpack.c.b16 %v2291_v61, %v2290_v8  ;;  %v2549_v32 = vpack.c.b16 %v2541_v12, %v2540_v25 }
 0x13a   : > { %v1015_v2 = vadd.f32 %v993_v47, %v762_v26 }
 0x13b   : > { %v1191_v30 = vpop.f32.mrf.mxu3  ;;  %v742_v55 = vpop.f32.mrf.mxu1 }
 0x13c   : > { %v1213_v39 = vadd.f32 %v1191_v30, %v1015_v2  ;;  %v763_v6 = vadd.f32 %v742_v55, %v4462_v52  ;;  %v3549_v52 = vld [vmem:[%s3956_s20 + $0x6c] sm:$0xff]  ;;  %s175_s20 = sand.u32 1, %s3807_s13  }
 0x13d   : > { %v1571_v9 = vpop.f32.mrf.mxu0  ;;  %s2829_s21 = sshll.u32 %s175_s20, 6  ;;  %s2720_s8 = scalar_lea.sflag [#allocation3], %s175_s20 }
 0x13e   : > { %v4744_v19 = vadd.f32 %v1569_v49, %v1213_v39  ;;  %s4761_s24 = scalar_lea.vmem [#allocation2], %s2829_s21 }
 0x13f   : > { %s2735_s16 = sshll.u32 %s4761_s24, 4  ;;  %s2736_s16 = int_to_ptr.vmem [resolvable:$true] %s2735_s16 }
 0x141   : > { %v995_v17 = vpop.f32.mrf.mxu2 }
 0x142   : > { %v1016_v45 = vadd.f32 %v995_v17, %v763_v6 }
 0x143   : > { %v1193_v35 = vpop.f32.mrf.mxu3  ;;  %v745_v23 = vpop.f32.mrf.mxu1 }
 0x144   : > { %v1214_v53 = vadd.f32 %v1193_v35, %v1016_v45  ;;  %v764_v20 = vadd.f32 %v745_v23, %v4491_v24 }
 0x145   : > { %v1574_v43 = vpop.f32.mrf.mxu0 }
 0x146   : > { %1823 = vmatmul.bf16.gmra.mxu1 %v1723_v36  ;;  %2021 = vmatmul.bf16.gmra.mxu2 %v3549_v52  ;;  %v4748_v44 = vadd.f32 %v1571_v9, %v1214_v53 }
 0x148   : > { %2399 = vmatmul.bf16.gmra.mxu3 %v2299_v37  ;;  %2649 = vmatmul.bf16.gmra.mxu0 %v2549_v32 }
 0x149   : > { %v998_v7 = vpop.f32.mrf.mxu2 }
 0x14a   : > { %v1017_v40 = vadd.f32 %v998_v7, %v764_v20 }
 0x14b   : > { %v1196_v46 = vpop.f32.mrf.mxu3  ;;  %v747_v33 = vpop.f32.mrf.mxu1 }
 0x14c   : > { %v1215_v26 = vadd.f32 %v1196_v46, %v1017_v40  ;;  %v765_v49 = vadd.f32 %v747_v33, %v4510_v54 }
 0x14d   : > { %v1576_v14 = vpop.f32.mrf.mxu0 }
 0x14e   : > { %v4751_v57 = vadd.f32 %v1574_v43, %v1215_v26 }
 0x151   : > { %v1000_v58 = vpop.f32.mrf.mxu2 }
 0x152   : > { %v1018_v62 = vadd.f32 %v1000_v58, %v765_v49 }
 0x153   : > { %v1198_v24 = vpop.f32.mrf.mxu3  ;;  %v1789_v48 = vpop.f32.mrf.mxu1 }
 0x154   : > { %v1216_v63 = vadd.f32 %v1198_v24, %v1018_v62  ;;  %v1829_v1 = vadd.f32 %v1789_v48, %v4541_v56 }
 0x155   : > { %v2615_v60 = vpop.f32.mrf.mxu0 }
 0x156   : > { %v4753_v59 = vadd.f32 %v1576_v14, %v1216_v63 }
 0x159   : > { %v1987_v4 = vpop.f32.mrf.mxu2 }
 0x15a   : > { %v2027_v47 = vadd.f32 %v1987_v4, %v1829_v1 }
 0x15b   : > { %v2365_v5 = vpop.f32.mrf.mxu3  ;;  %v1791_v21 = vpop.f32.mrf.mxu1 }
 0x15c   : > { %v2405_v2 = vadd.f32 %v2365_v5, %v2027_v47  ;;  %v1830_v30 = vadd.f32 %v1791_v21, %v4552_v38 }
 0x15d   : > { %v2617_v54 = vpop.f32.mrf.mxu0 }
 0x15e   : > { %v2655_v15 = vadd.f32 %v2615_v60, %v2405_v2 }
 0x160   : > { %v2671_v27 = vmax.f32 %v2655_v15, 0.0 }
 0x161   : > { %v1989_v55 = vpop.f32.mrf.mxu2 }
 0x162   : > { %v2028_v3 = vadd.f32 %v1989_v55, %v1830_v30 }
 0x163   : > { %v2367_v0 = vpop.f32.mrf.mxu3  ;;  %v1794_v13 = vpop.f32.mrf.mxu1 }
 0x164   : > { %v2406_v39 = vadd.f32 %v2367_v0, %v2028_v3  ;;  %v1831_v28 = vadd.f32 %v1794_v13, %v4575_v11 }
 0x165   : > { %v2620_v6 = vpop.f32.mrf.mxu0 }
 0x166   : > { %v2656_v9 = vadd.f32 %v2617_v54, %v2406_v39 }
 0x168   : > { %v2672_v56 = vmax.f32 %v2656_v9, 0.0 }
 0x169   : > { %v1992_v29 = vpop.f32.mrf.mxu2 }
 0x16a   : > { %v3578_v22 = vpack.c.bf16 %v2672_v56, %v2671_v27  ;;  %v2029_v38 = vadd.f32 %v1992_v29, %v1831_v28 }
 0x16b   : > { %v2370_v8 = vpop.f32.mrf.mxu3  ;;  %v1796_v61 = vpop.f32.mrf.mxu1 }
 0x16c   : > { %3579 = vst [vmem:[%s4761_s24] sm:$0xff] %v3578_v22   ;;  %v2407_v12 = vadd.f32 %v2370_v8, %v2029_v38  ;;  %v1832_v17 = vadd.f32 %v1796_v61, %v4592_v50 }
 0x16d   : > { %v2622_v25 = vpop.f32.mrf.mxu0 }
 0x16e   : > { %v2657_v23 = vadd.f32 %v2620_v6, %v2407_v12 }
 0x170   : > { %v2673_v53 = vmax.f32 %v2657_v23, 0.0 }
 0x171   : > { %v1994_v45 = vpop.f32.mrf.mxu2 }
 0x172   : > { %v2030_v35 = vadd.f32 %v1994_v45, %v1832_v17 }
 0x173   : > { %v2372_v36 = vpop.f32.mrf.mxu3  ;;  %v1799_v52 = vpop.f32.mrf.mxu1 }
 0x174   : > { %v2408_v37 = vadd.f32 %v2372_v36, %v2030_v35  ;;  %v1833_v40 = vadd.f32 %v1799_v52, %v4615_v34 }
 0x175   : > { %v2625_v32 = vpop.f32.mrf.mxu0 }
 0x176   : > { %v2658_v11 = vadd.f32 %v2622_v25, %v2408_v37 }
 0x178   : > { %v2674_v20 = vmax.f32 %v2658_v11, 0.0 }
 0x179   : > { %v1997_v43 = vpop.f32.mrf.mxu2 }
 0x17a   : > { %v3583_v7 = vpack.c.bf16 %v2674_v20, %v2673_v53  ;;  %v2031_v26 = vadd.f32 %v1997_v43, %v1833_v40 }
 0x17b   : > { %v2375_v46 = vpop.f32.mrf.mxu3  ;;  %v1801_v33 = vpop.f32.mrf.mxu1 }
 0x17c   : > { %3615 = vst [vmem:[%s4761_s24 + $0x8] sm:$0xff] %v3583_v7   ;;  %v2409_v49 = vadd.f32 %v2375_v46, %v2031_v26  ;;  %v1834_v14 = vadd.f32 %v1801_v33, %v4626_v18 }
 0x17d   : > { %v2627_v50 = vpop.f32.mrf.mxu0 }
 0x17e   : > { %v2659_v63 = vadd.f32 %v2625_v32, %v2409_v49 }
 0x180   : > { %v2675_v5 = vmax.f32 %v2659_v63, 0.0 }
 0x181   : > { %v1999_v58 = vpop.f32.mrf.mxu2 }
 0x182   : > { %v2032_v62 = vadd.f32 %v1999_v58, %v1834_v14 }
 0x183   : > { %v2377_v24 = vpop.f32.mrf.mxu3  ;;  %v1804_v48 = vpop.f32.mrf.mxu1 }
 0x184   : > { %v2410_v60 = vadd.f32 %v2377_v24, %v2032_v62  ;;  %v1835_v54 = vadd.f32 %v1804_v48, %v4649_v42 }
 0x185   : > { %v2630_v4 = vpop.f32.mrf.mxu0 }
 0x186   : > { %v2660_v1 = vadd.f32 %v2627_v50, %v2410_v60 }
 0x188   : > { %v2676_v21 = vmax.f32 %v2660_v1, 0.0 }
 0x189   : > { %v2002_v34 = vpop.f32.mrf.mxu2 }
 0x18a   : > { %v3588_v47 = vpack.c.bf16 %v2676_v21, %v2675_v5  ;;  %v2033_v55 = vadd.f32 %v2002_v34, %v1835_v54 }
 0x18b   : > { %v2380_v2 = vpop.f32.mrf.mxu3  ;;  %v1806_v30 = vpop.f32.mrf.mxu1 }
 0x18c   : > { %3616 = vst [vmem:[%s4761_s24 + $0x10] sm:$0xff] %v3588_v47   ;;  %v2411_v3 = vadd.f32 %v2380_v2, %v2033_v55  ;;  %v1836_v0 = vadd.f32 %v1806_v30, %v4665_v16 }
 0x18d   : > { %v2632_v18 = vpop.f32.mrf.mxu0 }
 0x18e   : > { %v2661_v9 = vadd.f32 %v2630_v4, %v2411_v3 }
 0x190   : > { %v2677_v22 = vmax.f32 %v2661_v9, 0.0 }
 0x191   : > { %v2004_v13 = vpop.f32.mrf.mxu2 }
 0x192   : > { %v2034_v15 = vadd.f32 %v2004_v13, %v1836_v0 }
 0x193   : > { %v2382_v39 = vpop.f32.mrf.mxu3  ;;  %v1809_v6 = vpop.f32.mrf.mxu1 }
 0x194   : > { %v2412_v27 = vadd.f32 %v2382_v39, %v2034_v15  ;;  %v1837_v61 = vadd.f32 %v1809_v6, %v4687_v10 }
 0x195   : > { %v2635_v56 = vpop.f32.mrf.mxu0 }
 0x196   : > { %v2662_v29 = vadd.f32 %v2632_v18, %v2412_v27 }
 0x198   : > { %v2678_v28 = vmax.f32 %v2662_v29, 0.0 }
 0x199   : > { %v2007_v42 = vpop.f32.mrf.mxu2 }
 0x19a   : > { %v3593_v8 = vpack.c.bf16 %v2678_v28, %v2677_v22  ;;  %v2035_v12 = vadd.f32 %v2007_v42, %v1837_v61 }
 0x19b   : > { %v2385_v38 = vpop.f32.mrf.mxu3  ;;  %v1811_v25 = vpop.f32.mrf.mxu1 }
 0x19c   : > { %3617 = vst [vmem:[%s4761_s24 + $0x18] sm:$0xff] %v3593_v8   ;;  %v2413_v17 = vadd.f32 %v2385_v38, %v2035_v12  ;;  %v1838_v45 = vadd.f32 %v1811_v25, %v4697_v51 }
 0x19d   : > { %v2637_v16 = vpop.f32.mrf.mxu0 }
 0x19e   : > { %v2663_v37 = vadd.f32 %v2635_v56, %v2413_v17 }
 0x1a0   : > { %v2679_v20 = vmax.f32 %v2663_v37, 0.0 }
 0x1a1   : > { %v2009_v35 = vpop.f32.mrf.mxu2 }
 0x1a2   : > { %v2036_v36 = vadd.f32 %v2009_v35, %v1838_v45 }
 0x1a3   : > { %v2387_v52 = vpop.f32.mrf.mxu3  ;;  %v1814_v23 = vpop.f32.mrf.mxu1 }
 0x1a4   : > { %v2414_v32 = vadd.f32 %v2387_v52, %v2036_v36  ;;  %v1839_v40 = vadd.f32 %v1814_v23, %v4719_v31 }
 0x1a5   : > { %v2640_v11 = vpop.f32.mrf.mxu0 }
 0x1a6   : > { %v2664_v53 = vadd.f32 %v2637_v16, %v2414_v32 }
 0x1a8   : > { %v2680_v43 = vmax.f32 %v2664_v53, 0.0 }
 0x1a9   : > { %v2012_v10 = vpop.f32.mrf.mxu2 }
 0x1aa   : > { %v3598_v7 = vpack.c.bf16 %v2680_v43, %v2679_v20  ;;  %v2037_v26 = vadd.f32 %v2012_v10, %v1839_v40 }
 0x1ab   : > { %v2390_v46 = vpop.f32.mrf.mxu3  ;;  %v1816_v33 = vpop.f32.mrf.mxu1 }
 0x1ac   : > { %3618 = vst [vmem:[%s4761_s24 + $0x20] sm:$0xff] %v3598_v7   ;;  %v2415_v50 = vadd.f32 %v2390_v46, %v2037_v26  ;;  %v1840_v49 = vadd.f32 %v1816_v33, %v4728_v41 }
 0x1ad   : > { %v2642_v51 = vpop.f32.mrf.mxu0 }
 0x1ae   : > { %v2665_v48 = vadd.f32 %v2640_v11, %v2415_v50 }
 0x1b0   : > { %v2681_v1 = vmax.f32 %v2665_v48, 0.0 }
 0x1b1   : > { %v2014_v14 = vpop.f32.mrf.mxu2 }
 0x1b2   : > { %v2038_v58 = vadd.f32 %v2014_v14, %v1840_v49 }
 0x1b3   : > { %v2392_v62 = vpop.f32.mrf.mxu3  ;;  %v1819_v24 = vpop.f32.mrf.mxu1 }
 0x1b4   : > { %v2416_v63 = vadd.f32 %v2392_v62, %v2038_v58  ;;  %v1841_v34 = vadd.f32 %v1819_v24, %v4744_v19 }
 0x1b5   : > { %v2645_v4 = vpop.f32.mrf.mxu0 }
 0x1b6   : > { %v2666_v60 = vadd.f32 %v2642_v51, %v2416_v63 }
 0x1b8   : > { %v2682_v5 = vmax.f32 %v2666_v60, 0.0 }
 0x1b9   : > { %v2017_v31 = vpop.f32.mrf.mxu2 }
 0x1ba   : > { %v3603_v21 = vpack.c.bf16 %v2682_v5, %v2681_v1  ;;  %v2039_v2 = vadd.f32 %v2017_v31, %v1841_v34 }
 0x1bb   : > { %v2395_v47 = vpop.f32.mrf.mxu3  ;;  %v1821_v54 = vpop.f32.mrf.mxu1 }
 0x1bc   : > { %3619 = vst [vmem:[%s4761_s24 + $0x28] sm:$0xff] %v3603_v21   ;;  %v2417_v41 = vadd.f32 %v2395_v47, %v2039_v2  ;;  %v1842_v30 = vadd.f32 %v1821_v54, %v4748_v44 }
 0x1bd   : > { %v2647_v55 = vpop.f32.mrf.mxu0 }
 0x1be   : > { %v2667_v15 = vadd.f32 %v2645_v4, %v2417_v41 }
 0x1c0   : > { %v2683_v9 = vmax.f32 %v2667_v15, 0.0 }
 0x1c1   : > { %v2019_v18 = vpop.f32.mrf.mxu2 }
 0x1c2   : > { %v2040_v3 = vadd.f32 %v2019_v18, %v1842_v30 }
 0x1c3   : > { %v2397_v0 = vpop.f32.mrf.mxu3  ;;  %v1824_v13 = vpop.f32.mrf.mxu1 }
 0x1c4   : > { %v2418_v39 = vadd.f32 %v2397_v0, %v2040_v3  ;;  %v1843_v29 = vadd.f32 %v1824_v13, %v4751_v57 }
 0x1c5   : > { %v2650_v44 = vpop.f32.mrf.mxu0 }
 0x1c6   : > { %v2668_v6 = vadd.f32 %v2647_v55, %v2418_v39 }
 0x1c8   : > { %v2684_v19 = vmax.f32 %v2668_v6, 0.0 }
 0x1c9   : > { %v2022_v27 = vpop.f32.mrf.mxu2 }
 0x1ca   : > { %v3608_v56 = vpack.c.bf16 %v2684_v19, %v2683_v9  ;;  %v2041_v28 = vadd.f32 %v2022_v27, %v1843_v29 }
 0x1cb   : > { %v2400_v22 = vpop.f32.mrf.mxu3  ;;  %v1826_v42 = vpop.f32.mrf.mxu1 }
 0x1cc   : > { %3620 = vst [vmem:[%s4761_s24 + $0x30] sm:$0xff] %v3608_v56   ;;  %v2419_v8 = vadd.f32 %v2400_v22, %v2041_v28  ;;  %v1844_v61 = vadd.f32 %v1826_v42, %v4753_v59 }
 0x1cd   : > { %v2652_v17 = vpop.f32.mrf.mxu0 }
 0x1ce   : > { %v2669_v57 = vadd.f32 %v2650_v44, %v2419_v8 }
 0x1d0   : > { %v2685_v35 = vmax.f32 %v2669_v57, 0.0 }
 0x1d1   : > { %v2024_v38 = vpop.f32.mrf.mxu2 }
 0x1d2   : > { %v2042_v25 = vadd.f32 %v2024_v38, %v1844_v61 }
 0x1d3   : > { %v2402_v12 = vpop.f32.mrf.mxu3 }
 0x1d4   : > { %v2420_v16 = vadd.f32 %v2402_v12, %v2042_v25 }
 0x1d6   : > { %v2670_v45 = vadd.f32 %v2652_v17, %v2420_v16 }
 0x1d8   : > { %v2686_v36 = vmax.f32 %v2670_v45, 0.0 }
 0x1da   : > { %v3613_v59 = vpack.c.bf16 %v2686_v36, %v2685_v35 }
 0x1dc   : > { %3621 = vst [vmem:[%s4761_s24 + $0x38] sm:$0xff] %v3613_v59  }
 0x1dd   : > { %3764 = shalt.err (!%p3761_p6)
}
 0x1de   : > { %s3833_s20 = smov 64   ;;  %s3834_s24 = smov 4  }
 0x1df   : > { %3647 = dma.vmem_to_hbm [thread:$0]  (%p3906_p3), %s2736_s16, 1024, %s2738_s7, %s2720_s8, %s3833_s20, %s3833_s20, %s3834_s24  }
 0x1e0 PF: > { %p3653_p7 = scmp.ge.s32.totalorder %s3831_s19, 2  ;;  %s2752_s4 = sand.u32 1, %s3803_s12  }
 0x1e1   : > { %s2753_s5 = scalar_lea.sflag [#allocation3], %s2752_s4 }
 0x1e2   : > { %p3650_p9 = pnand %p3653_p7, %p3915_p8 }
 0x1e4   : > { %p3651_p10 = pneg %p3650_p9 }
 0x1e6   : > { %3798 = dma.done.wait (%p3651_p10), %s2753_s5, 1024  }
 0x1e7   : > { %3800 = vsyncadd (%p3651_p10), %s2753_s5, 4294966272  ;;  %s16_s19 = sadd.s32 1, %s3831_s19   ;;  %s4840_s12 = smov %s3807_s13 }
 0x1e8   : > { %p13_p11 = scmp.ge.s32.totalorder %s16_s19, 6   ;;  %s4841_s13 = smov %s3811_s14 }
 0x1e9   : > { %s4842_s14 = smov %s3924_s30  ;;  %s4843_s15 = smov %s3823_s17 }
 0x1ea   : > { %s4844_s16 = smov %s3827_s18  ;;  %s4845_s17 = smov %s4848_s22 }
 0x1eb   : > { %s4846_s18 = smov %s4852_s23  ;;  %15 = sbr.rel (!%p13_p11) target bundleno = 5 (0x5), region = 78 }
 0x1f0   :  { %2759 = vsyncpa [#allocation3], 1 }
 0x1f1   :  { %2761 = vsyncpa [#allocation3 + $0x1], 1 }

</bundles_post_ra>
